<compile_context>
chip_gen: v7x
topology: tpu7x:2x2x1
jax: 0.10.0
libtpu: 0.0.40
codegen_flags: <defaults>
</compile_context>

<pallas_src>
import functools

import jax
import jax.numpy as jnp
from jax.experimental import pallas as pl
from jax.experimental.pallas import tpu as pltpu

NZ = 128
H1 = 256
H2 = 512
OUT = 784          # 28 * 28
OUT_PAD = 896      # 7 * 128: lane-dense output stores + 128-aligned MXU N tiles on layer 3


def _generator_kernel(x_ref, w1_ref, b1_ref, w2_ref, b2_ref, w3_ref, b3_ref, o_ref):
    """3 MXU matmuls (compute-dtype operands, f32 accumulation); bias/ReLU/tanh in f32;
    result cast to the (bf16 by default) output dtype for a half-width writeback."""
    x = x_ref[...]
    cdt = x.dtype  # matmul operand dtype (bf16 fast path, f32 exact path)

    h1 = jnp.dot(x, w1_ref[...], preferred_element_type=jnp.float32) + b1_ref[...]
    h1 = jnp.maximum(h1, 0.0).astype(cdt)

    h2 = jnp.dot(h1, w2_ref[...], preferred_element_type=jnp.float32) + b2_ref[...]
    h2 = jnp.maximum(h2, 0.0).astype(cdt)

    h3 = jnp.dot(h2, w3_ref[...], preferred_element_type=jnp.float32) + b3_ref[...]
    o_ref[...] = jnp.tanh(h3).astype(o_ref.dtype)


def _resident_spec(shape):
    """Grid-invariant weight/bias operand: constant index_map + single-buffered so the
    pipeline neither double-buffers it in VMEM nor re-DMAs it per grid step."""
    try:
        return pl.BlockSpec(shape, lambda i: (0, 0), pipeline_mode=pl.Buffered(1))
    except TypeError:  # older API without pipeline_mode: fall back to default buffering
        return pl.BlockSpec(shape, lambda i: (0, 0))


def _vmem_estimate_bytes(tm, compute_dtype):
    isz = jnp.dtype(compute_dtype).itemsize
    # weights/biases are single-buffered (resident); only per-step tiles double-buffer.
    weights = (NZ * H1 + H1 * H2 + H2 * OUT_PAD) * isz + (H1 + H2 + OUT_PAD) * 4
    per_step_io = tm * NZ * isz + tm * OUT_PAD * isz   # x tile + output tile (compute dtype)
    activations = tm * (H1 + H2 + OUT_PAD) * 4          # f32 intermediates inside the kernel
    return weights + 2 * per_step_io + activations


@functools.partial(jax.jit, static_argnames=("tm", "compute_dtype", "flat_output"))
def generator_forward(x, params, tm=None, compute_dtype=jnp.bfloat16, flat_output=False):
    """x: (B, nz) float32 -> (B, 1, 28, 28) float32 (or the lane-dense (B_pad, 896)
    compute-dtype slab when flat_output=True, to skip the un-pad relayout)."""
    w1, b1, w2, b2, w3, b3 = params
    B = x.shape[0]

    # --- batch tile selection -------------------------------------------------
    # Tiny batch: one resident tile (per-step pipeline overhead dominates splitting).
    # B > 64: at least 2 grid steps (keeps both v7x TensorCores busy via "parallel")
    # and up to 512-row tiles (amortizes ~0.35 us/step overhead; fits VMEM on all gens).
    if tm is None:
        tm = B if B <= 64 else min(512, pl.cdiv(B, 2))
    tm = max(16, ((tm + 15) // 16) * 16)   # multiple of 16: full bf16 sublane packing
    B_pad = pl.cdiv(B, tm) * tm

    # --- operand prep (cast + pad) at the pallas_call boundary ------------------
    xc = x.astype(compute_dtype)
    if B_pad != B:
        xc = jnp.pad(xc, ((0, B_pad - B), (0, 0)))
    w1c = w1.astype(compute_dtype)
    w2c = w2.astype(compute_dtype)
    w3c = jnp.pad(w3, ((0, 0), (0, OUT_PAD - OUT))).astype(compute_dtype)
    b3p = jnp.pad(b3, ((0, 0), (0, OUT_PAD - OUT)))  # biases stay f32

    # Only request an explicit VMEM limit when a large tile would exceed the
    # conservative default scoped limits (16 MiB v5e, 32 MiB v6e/v7x); cap at
    # 48 MiB so v7x (64 MiB physical per TC) keeps headroom.
    est = _vmem_estimate_bytes(tm, compute_dtype)
    vmem_limit = None
    if est > 12 * 1024 * 1024:
        vmem_limit = min(2 * est, 48 * 1024 * 1024)

    out_dtype = jnp.dtype(compute_dtype)  # bf16 output halves writeback bytes / vst count

    flat = pl.pallas_call(
        _generator_kernel,
        out_shape=jax.ShapeDtypeStruct((B_pad, OUT_PAD), out_dtype),
        grid_spec=pltpu.PrefetchScalarGridSpec(
            num_scalar_prefetch=0,
            grid=(B_pad // tm,),
            in_specs=[
                pl.BlockSpec((tm, NZ), lambda i: (i, 0)),  # x batch tile (pipelined)
                _resident_spec((NZ, H1)),                  # W1
                _resident_spec((1, H1)),                   # b1
                _resident_spec((H1, H2)),                  # W2
                _resident_spec((1, H2)),                   # b2
                _resident_spec((H2, OUT_PAD)),             # W3 (lane-padded)
                _resident_spec((1, OUT_PAD)),              # b3 (lane-padded)
            ],
            out_specs=pl.BlockSpec((tm, OUT_PAD), lambda i: (i, 0)),
        ),
        compiler_params=pltpu.CompilerParams(
            dimension_semantics=("parallel",),
            vmem_limit_bytes=vmem_limit,
        ),
    )(xc, w1c, b1, w2c, b2, w3c, b3p)

    if flat_output:
        # Consumer takes the lane-dense slab directly (rows [:B], cols [:784] valid);
        # avoids paying the un-pad/reshape relayout pass entirely.
        return flat

    # Glue to match PyTorch's .view(-1, 1, 28, 28); the slab is bf16 so this pass
    # reads half the bytes it would in f32. Cast back to f32 to match module dtype.
    return flat[:B, :OUT].astype(jnp.float32).reshape(-1, 1, 28, 28)


def init_params(key):
    """PyTorch Linear default init (U[-1/sqrt(fan_in), 1/sqrt(fan_in)]).
    Weights stored as (in_features, out_features) so the kernel computes x @ W."""
    def linear(key, fan_in, fan_out):
        kw, kb = jax.random.split(key)
        bound = 1.0 / jnp.sqrt(fan_in)
        w = jax.random.uniform(kw, (fan_in, fan_out), jnp.float32, -bound, bound)
        b = jax.random.uniform(kb, (1, fan_out), jnp.float32, -bound, bound)
        return w, b

    k1, k2, k3 = jax.random.split(key, 3)
    w1, b1 = linear(k1, NZ, H1)
    w2, b2 = linear(k2, H1, H2)
    w3, b3 = linear(k3, H2, OUT)
    return (w1, b1, w2, b2, w3, b3)


def _reference(x, params):
    w1, b1, w2, b2, w3, b3 = params
    h1 = jnp.maximum(x @ w1 + b1, 0.0)
    h2 = jnp.maximum(h1 @ w2 + b2, 0.0)
    return jnp.tanh(h2 @ w3 + b3).reshape(-1, 1, 28, 28)


if __name__ == "__main__":
    key = jax.random.PRNGKey(0)
    kx, kp = jax.random.split(key)

    params = init_params(kp)

    # Small batch -> single grid step, whole batch resident.
    B = 8
    x = jax.random.normal(kx, (B, NZ), dtype=jnp.float32)
    ref = _reference(x, params)

    # Exact f32 path (f32 operands, f32 output): matches the reference tightly.
    out_f32 = jax.block_until_ready(
        generator_forward(x, params, compute_dtype=jnp.float32))
    assert out_f32.shape == (B, 1, 28, 28)
    assert jnp.allclose(out_f32, ref, atol=1e-5, rtol=1e-5)

    # Default fast path: bf16 operands + bf16 store, f32 accumulation / bias / tanh.
    out_bf16 = jax.block_until_ready(generator_forward(x, params))
    assert out_bf16.shape == (B, 1, 28, 28)
    assert jnp.allclose(out_bf16, ref, atol=3e-2, rtol=0.0)

    # Non-divisible batch + explicit small tile -> exercises padding + multi-step grid.
    B2 = 20
    x2 = jax.random.normal(kx, (B2, NZ), dtype=jnp.float32)
    out2 = jax.block_until_ready(generator_forward(x2, params, tm=16))
    assert out2.shape == (B2, 1, 28, 28)
    assert jnp.allclose(out2, _reference(x2, params), atol=3e-2, rtol=0.0)

    # Default heuristic above the single-tile threshold -> >=2 grid steps (v7x-friendly).
    B3 = 96
    x3 = jax.random.normal(kx, (B3, NZ), dtype=jnp.float32)
    out3 = jax.block_until_ready(generator_forward(x3, params))
    assert out3.shape == (B3, 1, 28, 28)
    assert jnp.allclose(out3, _reference(x3, params), atol=3e-2, rtol=0.0)

    print("KERNEL_OK")
</pallas_src>

<mosaic_0001>
module attributes {stable_mosaic.version = 11 : i64} {
  func.func @_generator_kernel(%arg0: i32, %arg1: memref<16x128xf32, #tpu.memory_space<vmem>>, %arg2: memref<128x256xf32, #tpu.memory_space<vmem>>, %arg3: memref<1x256xf32, #tpu.memory_space<vmem>>, %arg4: memref<256x512xf32, #tpu.memory_space<vmem>>, %arg5: memref<1x512xf32, #tpu.memory_space<vmem>>, %arg6: memref<512x896xf32, #tpu.memory_space<vmem>>, %arg7: memref<1x896xf32, #tpu.memory_space<vmem>>, %arg8: memref<16x896xf32, #tpu.memory_space<vmem>>) attributes {dimension_semantics = [#tpu.dimension_semantics<parallel>], iteration_bounds = array<i64: 1>, scalar_prefetch = 0 : i64, scratch_operands = 0 : i64, tpu.core_type = #tpu.core_type<tc>, window_params = [{transform_indices = @transform_0, window_bounds = array<i64: 16, 128>}, {pipeline_mode = #tpu.pipeline_mode<synchronous>, transform_indices = @transform_1, window_bounds = array<i64: 128, 256>}, {pipeline_mode = #tpu.pipeline_mode<synchronous>, transform_indices = @transform_2, window_bounds = array<i64: 1, 256>}, {pipeline_mode = #tpu.pipeline_mode<synchronous>, transform_indices = @transform_3, window_bounds = array<i64: 256, 512>}, {pipeline_mode = #tpu.pipeline_mode<synchronous>, transform_indices = @transform_4, window_bounds = array<i64: 1, 512>}, {pipeline_mode = #tpu.pipeline_mode<synchronous>, transform_indices = @transform_5, window_bounds = array<i64: 512, 896>}, {pipeline_mode = #tpu.pipeline_mode<synchronous>, transform_indices = @transform_6, window_bounds = array<i64: 1, 896>}, {transform_indices = @transform_7, window_bounds = array<i64: 16, 896>}]} {
    %c0 = arith.constant 0 : index
    %c0_0 = arith.constant 0 : index
    %0 = vector.load %arg1[%c0, %c0_0] : memref<16x128xf32, #tpu.memory_space<vmem>>, vector<16x128xf32>
    %c0_1 = arith.constant 0 : index
    %c0_2 = arith.constant 0 : index
    %1 = vector.load %arg2[%c0_1, %c0_2] : memref<128x256xf32, #tpu.memory_space<vmem>>, vector<128x256xf32>
    %cst = arith.constant dense<0.000000e+00> : vector<16x256xf32>
    %2 = tpu.matmul %0, %1, %cst {dimension_numbers = #tpu.dot_dimension_numbers<[1], [0], [0], [1], [0, 0, 1, 1], [], []>} : vector<16x128xf32>, vector<128x256xf32>, vector<16x256xf32> -> vector<16x256xf32>
    %c0_3 = arith.constant 0 : index
    %c0_4 = arith.constant 0 : index
    %3 = vector.load %arg3[%c0_3, %c0_4] : memref<1x256xf32, #tpu.memory_space<vmem>>, vector<1x256xf32>
    %4 = vector.broadcast %3 : vector<1x256xf32> to vector<16x256xf32>
    %5 = arith.addf %2, %4 : vector<16x256xf32>
    %cst_5 = arith.constant 0.000000e+00 : f32
    %6 = vector.broadcast %cst_5 : f32 to vector<16x256xf32>
    %7 = arith.maximumf %5, %6 : vector<16x256xf32>
    %c0_6 = arith.constant 0 : index
    %c0_7 = arith.constant 0 : index
    %8 = vector.load %arg4[%c0_6, %c0_7] : memref<256x512xf32, #tpu.memory_space<vmem>>, vector<256x512xf32>
    %cst_8 = arith.constant dense<0.000000e+00> : vector<16x512xf32>
    %9 = tpu.matmul %7, %8, %cst_8 {dimension_numbers = #tpu.dot_dimension_numbers<[1], [0], [0], [1], [0, 0, 1, 1], [], []>} : vector<16x256xf32>, vector<256x512xf32>, vector<16x512xf32> -> vector<16x512xf32>
    %c0_9 = arith.constant 0 : index
    %c0_10 = arith.constant 0 : index
    %10 = vector.load %arg5[%c0_9, %c0_10] : memref<1x512xf32, #tpu.memory_space<vmem>>, vector<1x512xf32>
    %11 = vector.broadcast %10 : vector<1x512xf32> to vector<16x512xf32>
    %12 = arith.addf %9, %11 : vector<16x512xf32>
    %cst_11 = arith.constant 0.000000e+00 : f32
    %13 = vector.broadcast %cst_11 : f32 to vector<16x512xf32>
    %14 = arith.maximumf %12, %13 : vector<16x512xf32>
    %c0_12 = arith.constant 0 : index
    %c0_13 = arith.constant 0 : index
    %15 = vector.load %arg6[%c0_12, %c0_13] : memref<512x896xf32, #tpu.memory_space<vmem>>, vector<512x896xf32>
    %cst_14 = arith.constant dense<0.000000e+00> : vector<16x896xf32>
    %16 = tpu.matmul %14, %15, %cst_14 {dimension_numbers = #tpu.dot_dimension_numbers<[1], [0], [0], [1], [0, 0, 1, 1], [], []>} : vector<16x512xf32>, vector<512x896xf32>, vector<16x896xf32> -> vector<16x896xf32>
    %c0_15 = arith.constant 0 : index
    %c0_16 = arith.constant 0 : index
    %17 = vector.load %arg7[%c0_15, %c0_16] : memref<1x896xf32, #tpu.memory_space<vmem>>, vector<1x896xf32>
    %18 = vector.broadcast %17 : vector<1x896xf32> to vector<16x896xf32>
    %19 = arith.addf %16, %18 : vector<16x896xf32>
    %20 = math.tanh %19 : vector<16x896xf32>
    %c0_17 = arith.constant 0 : index
    %c0_18 = arith.constant 0 : index
    %21 = vector.load %arg8[%c0_17, %c0_18] : memref<16x896xf32, #tpu.memory_space<vmem>>, vector<16x896xf32>
    tpu.vector_store %arg8[%c0_17, %c0_18], %20 {strides = array<i32>} : memref<16x896xf32, #tpu.memory_space<vmem>>, vector<16x896xf32>,
    return
  }
  func.func @transform_0(%arg0: i32) -> (i32, i32) {
    %c0_i32 = arith.constant 0 : i32
    %c0_i32_0 = arith.constant 0 : i32
    return %arg0, %c0_i32 : i32, i32
  }
  func.func @transform_1(%arg0: i32) -> (i32, i32) {
    %c0_i32 = arith.constant 0 : i32
    %c0_i32_0 = arith.constant 0 : i32
    %c0_i32_1 = arith.constant 0 : i32
    return %c0_i32, %c0_i32_0 : i32, i32
  }
  func.func @transform_2(%arg0: i32) -> (i32, i32) {
    %c0_i32 = arith.constant 0 : i32
    %c0_i32_0 = arith.constant 0 : i32
    %c0_i32_1 = arith.constant 0 : i32
    return %c0_i32, %c0_i32_0 : i32, i32
  }
  func.func @transform_3(%arg0: i32) -> (i32, i32) {
    %c0_i32 = arith.constant 0 : i32
    %c0_i32_0 = arith.constant 0 : i32
    %c0_i32_1 = arith.constant 0 : i32
    return %c0_i32, %c0_i32_0 : i32, i32
  }
  func.func @transform_4(%arg0: i32) -> (i32, i32) {
    %c0_i32 = arith.constant 0 : i32
    %c0_i32_0 = arith.constant 0 : i32
    %c0_i32_1 = arith.constant 0 : i32
    return %c0_i32, %c0_i32_0 : i32, i32
  }
  func.func @transform_5(%arg0: i32) -> (i32, i32) {
    %c0_i32 = arith.constant 0 : i32
    %c0_i32_0 = arith.constant 0 : i32
    %c0_i32_1 = arith.constant 0 : i32
    return %c0_i32, %c0_i32_0 : i32, i32
  }
  func.func @transform_6(%arg0: i32) -> (i32, i32) {
    %c0_i32 = arith.constant 0 : i32
    %c0_i32_0 = arith.constant 0 : i32
    %c0_i32_1 = arith.constant 0 : i32
    return %c0_i32, %c0_i32_0 : i32, i32
  }
  func.func @transform_7(%arg0: i32) -> (i32, i32) {
    %c0_i32 = arith.constant 0 : i32
    %c0_i32_0 = arith.constant 0 : i32
    return %arg0, %c0_i32 : i32, i32
  }
}

</mosaic_0001>

<bundles_post_ra>
// kernel: generator_forward.1
= control target key start
LH: loop header
LB: loop body
LE: loop exit
PB: predicated region body
PF: predicated region fallthrough
CT: control target
= control target key end

     0   :  { %v2331_v3 = vmov 0.0   ;;  %s4358_s1 = inlined_call_operand.vmem [shape: f32[128,256], index: 1, kind: input, shape index: {}]   ;;  %s4359_s3 = inlined_call_operand.vmem [shape: f32[256,512], index: 3, kind: input, shape index: {}]   ;;  %s4360_s0 = inlined_call_operand.vmem [shape: f32[16,128], index: 0, kind: input, shape index: {}]   ;;  %s4361_s5 = inlined_call_operand.vmem [shape: f32[512,896], index: 5, kind: input, shape index: {}]   ;;  %s4362_s2 = inlined_call_operand.vmem [shape: f32[1,256], index: 2, kind: input, shape index: {}]   ;;  %s4363_s4 = inlined_call_operand.vmem [shape: f32[1,512], index: 4, kind: input, shape index: {}]   ;;  %s4364_s6 = inlined_call_operand.vmem [shape: f32[1,896], index: 6, kind: input, shape index: {}]   ;;  %s4365_s7 = inlined_call_operand.vmem [shape: f32[16,896], index: 7, kind: output, shape index: {}]  }
   0x1   :  { %v29_v0 = vld [vmem:[%s4358_s1 + $0x8] sm:$0xff]  ;;  %v31_v1 = vld [vmem:[%s4358_s1 + $0x18] sm:$0xff]  ;;  %v28_v2 = vld [vmem:[%s4358_s1] sm:$0xff]  ;;  %136 = vmatprep.mubr.f32.mxu0 %v2331_v3 }
   0x2   :  { %v1670_v4 = vpack.c.bf16 %v31_v1, %v29_v0  ;;  %v30_v5 = vld [vmem:[%s4358_s1 + $0x10] sm:$0xff]  ;;  %v33_v6 = vld [vmem:[%s4358_s1 + $0x28] sm:$0xff]  ;;  %v35_v7 = vld [vmem:[%s4358_s1 + $0x38] sm:$0xff] }
   0x3   :  { %v1672_v8 = vpack.c.bf16 %v30_v5, %v28_v2  ;;  %v1674_v9 = vpack.c.bf16 %v35_v7, %v33_v6  ;;  %v32_v10 = vld [vmem:[%s4358_s1 + $0x20] sm:$0xff]  ;;  %v34_v11 = vld [vmem:[%s4358_s1 + $0x30] sm:$0xff]  ;;  %v37_v12 = vld [vmem:[%s4358_s1 + $0x48] sm:$0xff] }
   0x4   :  { %1671 = vmatprep.subr.bf16.mxu0 %v1670_v4  ;;  %v39_v13 = vld [vmem:[%s4358_s1 + $0x58] sm:$0xff]  ;;  %v1676_v14 = vpack.c.bf16 %v34_v11, %v32_v10  ;;  %v36_v16 = vld [vmem:[%s4358_s1 + $0x40] sm:$0xff]  ;;  %v38_v17 = vld [vmem:[%s4358_s1 + $0x50] sm:$0xff] }
   0x5   :  { %1673 = vmatpush1.bf16.msra.mxu0 %v1672_v8  ;;  %v1678_v15 = vpack.c.bf16 %v39_v13, %v37_v12  ;;  %v41_v18 = vld [vmem:[%s4358_s1 + $0x68] sm:$0xff]  ;;  %v43_v19 = vld [vmem:[%s4358_s1 + $0x78] sm:$0xff]  ;;  %v1680_v20 = vpack.c.bf16 %v38_v17, %v36_v16  ;;  %v40_v22 = vld [vmem:[%s4358_s1 + $0x60] sm:$0xff] }
   0x6   :  { %1675 = vmatprep.subr.bf16.mxu0 %v1674_v9  ;;  %v1682_v21 = vpack.c.bf16 %v43_v19, %v41_v18  ;;  %v42_v23 = vld [vmem:[%s4358_s1 + $0x70] sm:$0xff]  ;;  %v45_v24 = vld [vmem:[%s4358_s1 + $0x88] sm:$0xff]  ;;  %v47_v25 = vld [vmem:[%s4358_s1 + $0x98] sm:$0xff] }
   0x7   :  { %v154_v26 = vld [vmem:[%s4359_s3 + $0x8] sm:$0xff]  ;;  %v1684_v28 = vpack.c.bf16 %v42_v23, %v40_v22  ;;  %v44_v29 = vld [vmem:[%s4358_s1 + $0x80] sm:$0xff]  ;;  %v1686_v32 = vpack.c.bf16 %v47_v25, %v45_v24  ;;  %v46_v33 = vld [vmem:[%s4358_s1 + $0x90] sm:$0xff] }
   0x8   :  { %v158_v27 = vld [vmem:[%s4359_s3 + $0x28] sm:$0xff]  ;;  %v153_v31 = vld [vmem:[%s4359_s3] sm:$0xff]  ;;  %v51_v36 = vld [vmem:[%s4358_s1 + $0xb8] sm:$0xff]  ;;  %v1688_v43 = vpack.c.bf16 %v46_v33, %v44_v29 }
   0x9   :  { %1677 = vmatpush1.bf16.msra.mxu0 %v1676_v14  ;;  %v1702_v30 = vpack.c.bf16 %v158_v27, %v154_v26  ;;  %v49_v34 = vld [vmem:[%s4358_s1 + $0xa8] sm:$0xff]  ;;  %v157_v35 = vld [vmem:[%s4359_s3 + $0x20] sm:$0xff]  ;;  %v50_v48 = vld [vmem:[%s4358_s1 + $0xb0] sm:$0xff] }
   0xa   :  { %1679 = vmatprep.subr.bf16.mxu0 %v1678_v15  ;;  %v1704_v37 = vpack.c.bf16 %v157_v35, %v153_v31  ;;  %v162_v38 = vld [vmem:[%s4359_s3 + $0x48] sm:$0xff]  ;;  %v161_v41 = vld [vmem:[%s4359_s3 + $0x40] sm:$0xff]  ;;  %v1690_v47 = vpack.c.bf16 %v51_v36, %v49_v34  ;;  %v55_v51 = vld [vmem:[%s4358_s1 + $0xd8] sm:$0xff] }
   0xb   :  { %1703 = vmatprep.subr.bf16.mxu1 %v1702_v30  ;;  %v166_v39 = vld [vmem:[%s4359_s3 + $0x68] sm:$0xff]  ;;  %v165_v42 = vld [vmem:[%s4359_s3 + $0x60] sm:$0xff]  ;;  %v54_v59 = vld [vmem:[%s4358_s1 + $0xd0] sm:$0xff] }
   0xc   :  { %v1706_v40 = vpack.c.bf16 %v166_v39, %v162_v38  ;;  %v48_v44 = vld [vmem:[%s4358_s1 + $0xa0] sm:$0xff]  ;;  %1705 = vmatpush1.bf16.msra.mxu1 %v1704_v37  ;;  %v1708_v45 = vpack.c.bf16 %v165_v42, %v161_v41  ;;  %v170_v46 = vld [vmem:[%s4359_s3 + $0x88] sm:$0xff]  ;;  %v59_v2 = vld [vmem:[%s4358_s1 + $0xf8] sm:$0xff] }
   0xd   :  { %1681 = vmatpush1.bf16.msra.mxu0 %v1680_v20  ;;  %v53_v49 = vld [vmem:[%s4358_s1 + $0xc8] sm:$0xff]  ;;  %v169_v53 = vld [vmem:[%s4359_s3 + $0x80] sm:$0xff]  ;;  %v1692_v57 = vpack.c.bf16 %v50_v48, %v48_v44  ;;  %v58_v8 = vld [vmem:[%s4358_s1 + $0xf0] sm:$0xff] }
   0xe   :  { %1683 = vmatprep.subr.bf16.mxu0 %v1682_v21  ;;  %1707 = vmatprep.subr.bf16.mxu1 %v1706_v40  ;;  %v174_v50 = vld [vmem:[%s4359_s3 + $0xa8] sm:$0xff]  ;;  %v173_v54 = vld [vmem:[%s4359_s3 + $0xa0] sm:$0xff]  ;;  %v1694_v61 = vpack.c.bf16 %v55_v51, %v53_v49  ;;  %v156_v11 = vld [vmem:[%s4359_s3 + $0x18] sm:$0xff] }
   0xf   :  { %v1710_v52 = vpack.c.bf16 %v174_v50, %v170_v46  ;;  %v178_v55 = vld [vmem:[%s4359_s3 + $0xc8] sm:$0xff]  ;;  %v52_v58 = vld [vmem:[%s4358_s1 + $0xc0] sm:$0xff]  ;;  %v1712_v60 = vpack.c.bf16 %v173_v54, %v169_v53  ;;  %v160_v15 = vld [vmem:[%s4359_s3 + $0x38] sm:$0xff] }
  0x10   :  { %v182_v56 = vld [vmem:[%s4359_s3 + $0xe8] sm:$0xff]  ;;  %1709 = vmatpush1.bf16.msra.mxu1 %v1708_v45  ;;  %v177_v0 = vld [vmem:[%s4359_s3 + $0xc0] sm:$0xff]  ;;  %v1696_v6 = vpack.c.bf16 %v54_v59, %v52_v58  ;;  %v1766_v20 = vpack.c.bf16 %v160_v15, %v156_v11  ;;  %v155_v21 = vld [vmem:[%s4359_s3 + $0x10] sm:$0xff] }
  0x11   :  { %1685 = vmatpush1.bf16.msra.mxu0 %v1684_v28  ;;  %v57_v62 = vld [vmem:[%s4358_s1 + $0xe8] sm:$0xff]  ;;  %1711 = vmatprep.subr.bf16.mxu1 %v1710_v52  ;;  %v1714_v63 = vpack.c.bf16 %v182_v56, %v178_v55  ;;  %v181_v1 = vld [vmem:[%s4359_s3 + $0xe0] sm:$0xff]  ;;  %v159_v22 = vld [vmem:[%s4359_s3 + $0x30] sm:$0xff] }
  0x12   :  { %1687 = vmatprep.subr.bf16.mxu0 %v1686_v32  ;;  %v186_v4 = vld [vmem:[%s4359_s3 + $0x108] sm:$0xff]  ;;  %v56_v7 = vld [vmem:[%s4358_s1 + $0xe0] sm:$0xff]  ;;  %v1716_v9 = vpack.c.bf16 %v181_v1, %v177_v0  ;;  %v1698_v10 = vpack.c.bf16 %v59_v2, %v57_v62  ;;  %v164_v23 = vld [vmem:[%s4359_s3 + $0x58] sm:$0xff]  ;;  %v1768_v31 = vpack.c.bf16 %v159_v22, %v155_v21 }
  0x13   :  { %v190_v5 = vld [vmem:[%s4359_s3 + $0x128] sm:$0xff]  ;;  %v185_v13 = vld [vmem:[%s4359_s3 + $0x100] sm:$0xff]  ;;  %v1700_v18 = vpack.c.bf16 %v58_v8, %v56_v7  ;;  %v168_v25 = vld [vmem:[%s4359_s3 + $0x78] sm:$0xff] }
  0x14   :  { %1713 = vmatpush1.bf16.msra.mxu1 %v1712_v60  ;;  %v1718_v12 = vpack.c.bf16 %v190_v5, %v186_v4  ;;  %v189_v14 = vld [vmem:[%s4359_s3 + $0x120] sm:$0xff]  ;;  %v194_v16 = vld [vmem:[%s4359_s3 + $0x148] sm:$0xff]  ;;  %v1770_v32 = vpack.c.bf16 %v168_v25, %v164_v23  ;;  %v163_v33 = vld [vmem:[%s4359_s3 + $0x50] sm:$0xff] }
  0x15   :  { %1689 = vmatpush1.bf16.msra.mxu0 %v1688_v43  ;;  %1715 = vmatprep.subr.bf16.mxu1 %v1714_v63  ;;  %v198_v17 = vld [vmem:[%s4359_s3 + $0x168] sm:$0xff]  ;;  %v1720_v19 = vpack.c.bf16 %v189_v14, %v185_v13  ;;  %v193_v26 = vld [vmem:[%s4359_s3 + $0x140] sm:$0xff]  ;;  %v167_v34 = vld [vmem:[%s4359_s3 + $0x70] sm:$0xff] }
  0x16   :  { %1691 = vmatprep.subr.bf16.mxu0 %v1690_v47  ;;  %v1722_v24 = vpack.c.bf16 %v198_v17, %v194_v16  ;;  %v197_v27 = vld [vmem:[%s4359_s3 + $0x160] sm:$0xff]  ;;  %v202_v28 = vld [vmem:[%s4359_s3 + $0x188] sm:$0xff]  ;;  %v172_v35 = vld [vmem:[%s4359_s3 + $0x98] sm:$0xff]  ;;  %v1772_v44 = vpack.c.bf16 %v167_v34, %v163_v33 }
  0x17   :  { %v206_v29 = vld [vmem:[%s4359_s3 + $0x1a8] sm:$0xff]  ;;  %v26_v30 = vld [vmem:[%s4360_s0] sm:$0xff]  ;;  %v1724_v36 = vpack.c.bf16 %v197_v27, %v193_v26  ;;  %v176_v37 = vld [vmem:[%s4359_s3 + $0xb8] sm:$0xff] }
  0x18   :  { %1717 = vmatpush1.bf16.msra.mxu1 %v1716_v9  ;;  %v1726_v38 = vpack.c.bf16 %v206_v29, %v202_v28  ;;  %v201_v39 = vld [vmem:[%s4359_s3 + $0x180] sm:$0xff]  ;;  %v210_v41 = vld [vmem:[%s4359_s3 + $0x1c8] sm:$0xff]  ;;  %v1774_v45 = vpack.c.bf16 %v176_v37, %v172_v35  ;;  %v171_v46 = vld [vmem:[%s4359_s3 + $0x90] sm:$0xff] }
  0x19   :  { %1693 = vmatpush1.bf16.msra.mxu0 %v1692_v57  ;;  %1719 = vmatprep.subr.bf16.mxu1 %v1718_v12  ;;  %v205_v40 = vld [vmem:[%s4359_s3 + $0x1a0] sm:$0xff]  ;;  %v214_v42 = vld [vmem:[%s4359_s3 + $0x1e8] sm:$0xff]  ;;  %v175_v47 = vld [vmem:[%s4359_s3 + $0xb0] sm:$0xff] }
  0x1a   :  { %1695 = vmatprep.subr.bf16.mxu0 %v1694_v61  ;;  %v27_v43 = vld [vmem:[%s4360_s0 + $0x8] sm:$0xff]  ;;  %v1728_v48 = vpack.c.bf16 %v205_v40, %v201_v39  ;;  %v184_v49 = vld [vmem:[%s4359_s3 + $0xf8] sm:$0xff]  ;;  %v1730_v50 = vpack.c.bf16 %v214_v42, %v210_v41  ;;  %v209_v51 = vld [vmem:[%s4359_s3 + $0x1c0] sm:$0xff]  ;;  %v1776_v55 = vpack.c.bf16 %v175_v47, %v171_v46 }
  0x1b   :  { %v213_v52 = vld [vmem:[%s4359_s3 + $0x1e0] sm:$0xff]  ;;  %v218_v53 = vld [vmem:[%s4359_s3 + $0x208] sm:$0xff]  ;;  %v179_v57 = vld [vmem:[%s4359_s3 + $0xd0] sm:$0xff] }
  0x1c   :  { %1721 = vmatpush1.bf16.msra.mxu1 %v1720_v19  ;;  %v222_v54 = vld [vmem:[%s4359_s3 + $0x228] sm:$0xff]  ;;  %v183_v58 = vld [vmem:[%s4359_s3 + $0xf0] sm:$0xff]  ;;  %v188_v59 = vld [vmem:[%s4359_s3 + $0x118] sm:$0xff]  ;;  %v1732_v60 = vpack.c.bf16 %v213_v52, %v209_v51 }
  0x1d   :  { %1697 = vmatpush1.bf16.msra.mxu0 %v1696_v6  ;;  %1723 = vmatprep.subr.bf16.mxu1 %v1722_v24  ;;  %v192_v61 = vld [vmem:[%s4359_s3 + $0x138] sm:$0xff]  ;;  %v1734_v62 = vpack.c.bf16 %v222_v54, %v218_v53  ;;  %v217_v63 = vld [vmem:[%s4359_s3 + $0x200] sm:$0xff]  ;;  %v226_v1 = vld [vmem:[%s4359_s3 + $0x248] sm:$0xff]  ;;  %v1780_v4 = vpack.c.bf16 %v183_v58, %v179_v57 }
  0x1e   :  { %1699 = vmatprep.subr.bf16.mxu0 %v1698_v10  ;;  %v221_v0 = vld [vmem:[%s4359_s3 + $0x220] sm:$0xff]  ;;  %v230_v2 = vld [vmem:[%s4359_s3 + $0x268] sm:$0xff]  ;;  %v1782_v5 = vpack.c.bf16 %v192_v61, %v188_v59  ;;  %v187_v6 = vld [vmem:[%s4359_s3 + $0x110] sm:$0xff] }
  0x1f   :  { %v191_v7 = vld [vmem:[%s4359_s3 + $0x130] sm:$0xff]  ;;  %v196_v8 = vld [vmem:[%s4359_s3 + $0x158] sm:$0xff]  ;;  %v1736_v9 = vpack.c.bf16 %v221_v0, %v217_v63  ;;  %v1738_v11 = vpack.c.bf16 %v230_v2, %v226_v1  ;;  %v225_v12 = vld [vmem:[%s4359_s3 + $0x240] sm:$0xff] }
  0x20   :  { %1725 = vmatpush1.bf16.msra.mxu1 %v1724_v36  ;;  %v200_v10 = vld [vmem:[%s4359_s3 + $0x178] sm:$0xff]  ;;  %v229_v13 = vld [vmem:[%s4359_s3 + $0x260] sm:$0xff]  ;;  %v234_v14 = vld [vmem:[%s4359_s3 + $0x288] sm:$0xff]  ;;  %v1784_v16 = vpack.c.bf16 %v191_v7, %v187_v6 }
  0x21   :  { %1701 = vmatpush1.bf16.msra.mxu0 %v1700_v18  ;;  %1727 = vmatprep.subr.bf16.mxu1 %v1726_v38  ;;  %v238_v15 = vld [vmem:[%s4359_s3 + $0x2a8] sm:$0xff]  ;;  %v1786_v17 = vpack.c.bf16 %v200_v10, %v196_v8  ;;  %v195_v18 = vld [vmem:[%s4359_s3 + $0x150] sm:$0xff]  ;;  %v1740_v21 = vpack.c.bf16 %v229_v13, %v225_v12  ;;  %v208_v22 = vld [vmem:[%s4359_s3 + $0x1b8] sm:$0xff] }
  0x22   :  { %1767 = vmatprep.subr.bf16.mxu0 %v1766_v20  ;;  %v199_v19 = vld [vmem:[%s4359_s3 + $0x170] sm:$0xff]  ;;  %v204_v20 = vld [vmem:[%s4359_s3 + $0x198] sm:$0xff]  ;;  %v1742_v23 = vpack.c.bf16 %v238_v15, %v234_v14  ;;  %v233_v24 = vld [vmem:[%s4359_s3 + $0x280] sm:$0xff] }
  0x23   :  { %v237_v25 = vld [vmem:[%s4359_s3 + $0x2a0] sm:$0xff]  ;;  %v242_v26 = vld [vmem:[%s4359_s3 + $0x2c8] sm:$0xff]  ;;  %v1788_v28 = vpack.c.bf16 %v199_v19, %v195_v18  ;;  %v1790_v29 = vpack.c.bf16 %v208_v22, %v204_v20  ;;  %v216_v34 = vld [vmem:[%s4359_s3 + $0x1f8] sm:$0xff] }
  0x24   :  { %137 = vmatmul.mubr.f32.vlgmr.msra.gmra.mrb[0].mxu0 %v26_v30  ;;  %1729 = vmatpush1.bf16.msra.mxu1 %v1728_v48  ;;  %v246_v27 = vld [vmem:[%s4359_s3 + $0x2e8] sm:$0xff]  ;;  %v203_v30 = vld [vmem:[%s4359_s3 + $0x190] sm:$0xff]  ;;  %v1744_v33 = vpack.c.bf16 %v237_v25, %v233_v24  ;;  %v241_v36 = vld [vmem:[%s4359_s3 + $0x2c0] sm:$0xff] }
  0x25   :  { %142 = vmatprep.mubr.f32.mxu0 %v2331_v3  ;;  %1769 = vmatpush1.bf16.msra.mxu0 %v1768_v31  ;;  %v180_v3 = vld [vmem:[%s4359_s3 + $0xd8] sm:$0xff]  ;;  %v207_v31 = vld [vmem:[%s4359_s3 + $0x1b0] sm:$0xff]  ;;  %v1746_v35 = vpack.c.bf16 %v246_v27, %v242_v26  ;;  %v245_v37 = vld [vmem:[%s4359_s3 + $0x2e0] sm:$0xff] }
  0x26   :  { %1771 = vmatprep.subr.bf16.mxu0 %v1770_v32  ;;  %v1778_v56 = vpack.c.bf16 %v184_v49, %v180_v3  ;;  %1731 = vmatprep.subr.bf16.mxu1 %v1730_v50  ;;  %v212_v32 = vld [vmem:[%s4359_s3 + $0x1d8] sm:$0xff]  ;;  %v250_v38 = vld [vmem:[%s4359_s3 + $0x308] sm:$0xff]  ;;  %v1792_v40 = vpack.c.bf16 %v207_v31, %v203_v30  ;;  %v211_v42 = vld [vmem:[%s4359_s3 + $0x1d0] sm:$0xff] }
  0x27   :  { %v254_v39 = vld [vmem:[%s4359_s3 + $0x328] sm:$0xff]  ;;  %v1794_v41 = vpack.c.bf16 %v216_v34, %v212_v32  ;;  %v224_v46 = vld [vmem:[%s4359_s3 + $0x238] sm:$0xff]  ;;  %v249_v3 = vld [vmem:[%s4359_s3 + $0x300] sm:$0xff] }
  0x28   :  { %143 = vmatmul.mubr.f32.gmra.mrb[2].mxu0 %v27_v43  ;;  %1733 = vmatpush1.bf16.msra.mxu1 %v1732_v60  ;;  %v215_v43 = vld [vmem:[%s4359_s3 + $0x1f0] sm:$0xff]  ;;  %v1750_v47 = vpack.c.bf16 %v254_v39, %v250_v38  ;;  %v253_v48 = vld [vmem:[%s4359_s3 + $0x320] sm:$0xff]  ;;  %v258_v49 = vld [vmem:[%s4359_s3 + $0x348] sm:$0xff] }
  0x29   :  { %1773 = vmatpush1.bf16.msra.mxu0 %v1772_v44  ;;  %1735 = vmatprep.subr.bf16.mxu1 %v1734_v62  ;;  %v220_v44 = vld [vmem:[%s4359_s3 + $0x218] sm:$0xff]  ;;  %v262_v50 = vld [vmem:[%s4359_s3 + $0x368] sm:$0xff]  ;;  %v1796_v51 = vpack.c.bf16 %v215_v43, %v211_v42  ;;  %v219_v53 = vld [vmem:[%s4359_s3 + $0x210] sm:$0xff] }
  0x2a   :  { %1775 = vmatprep.subr.bf16.mxu0 %v1774_v45  ;;  %v1748_v45 = vpack.c.bf16 %v245_v37, %v241_v36  ;;  %v1798_v52 = vpack.c.bf16 %v224_v46, %v220_v44  ;;  %v223_v54 = vld [vmem:[%s4359_s3 + $0x230] sm:$0xff]  ;;  %v232_v57 = vld [vmem:[%s4359_s3 + $0x278] sm:$0xff]  ;;  %v1754_v58 = vpack.c.bf16 %v262_v50, %v258_v49  ;;  %v257_v59 = vld [vmem:[%s4359_s3 + $0x340] sm:$0xff] }
  0x2b   :  { %v261_v60 = vld [vmem:[%s4359_s3 + $0x360] sm:$0xff]  ;;  %v266_v61 = vld [vmem:[%s4359_s3 + $0x388] sm:$0xff]  ;;  %v1800_v63 = vpack.c.bf16 %v223_v54, %v219_v53  ;;  %v227_v1 = vld [vmem:[%s4359_s3 + $0x250] sm:$0xff] }
  0x2c   :  { %1737 = vmatpush1.bf16.msra.mxu1 %v1736_v9  ;;  %v270_v62 = vld [vmem:[%s4359_s3 + $0x3a8] sm:$0xff]  ;;  %v231_v2 = vld [vmem:[%s4359_s3 + $0x270] sm:$0xff]  ;;  %v240_v6 = vld [vmem:[%s4359_s3 + $0x2b8] sm:$0xff] }
  0x2d   :  { %1777 = vmatpush1.bf16.msra.mxu0 %v1776_v55  ;;  %1739 = vmatprep.subr.bf16.mxu1 %v1738_v11  ;;  %v228_v55 = vld [vmem:[%s4359_s3 + $0x258] sm:$0xff]  ;;  %v1758_v7 = vpack.c.bf16 %v270_v62, %v266_v61  ;;  %v1804_v8 = vpack.c.bf16 %v231_v2, %v227_v1  ;;  %v235_v10 = vld [vmem:[%s4359_s3 + $0x290] sm:$0xff]  ;;  %v265_v34 = vld [vmem:[%s4359_s3 + $0x380] sm:$0xff] }
  0x2e   :  { %1779 = vmatprep.subr.bf16.mxu0 %v1778_v56  ;;  %v1752_v56 = vpack.c.bf16 %v253_v48, %v249_v3  ;;  %v1802_v0 = vpack.c.bf16 %v232_v57, %v228_v55  ;;  %v239_v11 = vld [vmem:[%s4359_s3 + $0x2b0] sm:$0xff]  ;;  %v244_v12 = vld [vmem:[%s4359_s3 + $0x2d8] sm:$0xff]  ;;  %v277_v46 = vld [vmem:[%s4359_s3 + $0x3e0] sm:$0xff]  ;;  %v62_v57 = vlaneseq }
  0x2f   :  { %v248_v13 = vld [vmem:[%s4359_s3 + $0x2f8] sm:$0xff]  ;;  %v1808_v14 = vpack.c.bf16 %v239_v11, %v235_v10  ;;  %v251_v22 = vld [vmem:[%s4359_s3 + $0x310] sm:$0xff]  ;;  %v465_v1 = vld [vmem:[%s4361_s5] sm:$0xff] }
  0x30   :  { %1741 = vmatpush1.bf16.msra.mxu1 %v1740_v21  ;;  %v1810_v15 = vpack.c.bf16 %v248_v13, %v244_v12  ;;  %v252_v18 = vld [vmem:[%s4359_s3 + $0x318] sm:$0xff]  ;;  %v267_v36 = vld [vmem:[%s4359_s3 + $0x390] sm:$0xff]  ;;  %v482_v11 = vld [vmem:[%s4361_s5 + $0x88] sm:$0xff] }
  0x31   :  { %1781 = vmatpush1.bf16.msra.mxu0 %v1780_v4  ;;  %1743 = vmatprep.subr.bf16.mxu1 %v1742_v23  ;;  %v1756_v4 = vpack.c.bf16 %v261_v60, %v257_v59  ;;  %v256_v19 = vld [vmem:[%s4359_s3 + $0x338] sm:$0xff]  ;;  %v255_v23 = vld [vmem:[%s4359_s3 + $0x330] sm:$0xff]  ;;  %v60_v60 = vld [vmem:[%s4362_s2] sm:$0x3] }
  0x32   :  { %1783 = vmatprep.subr.bf16.mxu0 %v1782_v5  ;;  %v236_v5 = vld [vmem:[%s4359_s3 + $0x298] sm:$0xff]  ;;  %v1814_v21 = vpack.c.bf16 %v256_v19, %v252_v18  ;;  %v1816_v26 = vpack.c.bf16 %v255_v23, %v251_v22  ;;  %v271_v38 = vld [vmem:[%s4359_s3 + $0x3b0] sm:$0xff]  ;;  %v489_v12 = vld [vmem:[%s4361_s5 + $0xc0] sm:$0xff] }
  0x33   :  { %v1806_v9 = vpack.c.bf16 %v240_v6, %v236_v5  ;;  %v260_v24 = vld [vmem:[%s4359_s3 + $0x358] sm:$0xff]  ;;  %v1824_v39 = vpack.c.bf16 %v271_v38, %v267_v36  ;;  %v275_v48 = vld [vmem:[%s4359_s3 + $0x3d0] sm:$0xff]  ;;  %v486_v18 = vld [vmem:[%s4361_s5 + $0xa8] sm:$0xff]  ;;  %v1962_v23 = vpack.c.bf16 %v489_v12, %v482_v11 }
  0x34   :  { %1745 = vmatpush1.bf16.msra.mxu1 %v1744_v33  ;;  %v264_v25 = vld [vmem:[%s4359_s3 + $0x378] sm:$0xff]  ;;  %v279_v49 = vld [vmem:[%s4359_s3 + $0x3f0] sm:$0xff]  ;;  %v542_v11 = vld [vmem:[%s4361_s5 + $0x268] sm:$0xff] }
  0x35   :  { %1785 = vmatpush1.bf16.msra.mxu0 %v1784_v16  ;;  %1747 = vmatprep.subr.bf16.mxu1 %v1746_v35  ;;  %v243_v16 = vld [vmem:[%s4359_s3 + $0x2d0] sm:$0xff]  ;;  %v1818_v27 = vpack.c.bf16 %v264_v25, %v260_v24  ;;  %v268_v30 = vld [vmem:[%s4359_s3 + $0x398] sm:$0xff]  ;;  %v269_v35 = vld [vmem:[%s4359_s3 + $0x3a0] sm:$0xff]  ;;  %v1828_v50 = vpack.c.bf16 %v279_v49, %v275_v48 }
  0x36   :  { %1787 = vmatprep.subr.bf16.mxu0 %v1786_v17  ;;  %v247_v17 = vld [vmem:[%s4359_s3 + $0x2f0] sm:$0xff]  ;;  %v272_v31 = vld [vmem:[%s4359_s3 + $0x3b8] sm:$0xff]  ;;  %v1760_v37 = vpack.c.bf16 %v269_v35, %v265_v34  ;;  %v481_v24 = vld [vmem:[%s4361_s5 + $0x80] sm:$0xff] }
  0x37   :  { %v1812_v20 = vpack.c.bf16 %v247_v17, %v243_v16  ;;  %v1822_v33 = vpack.c.bf16 %v272_v31, %v268_v30  ;;  %v276_v42 = vld [vmem:[%s4359_s3 + $0x3d8] sm:$0xff]  ;;  %v475_v55 = vld [vmem:[%s4361_s5 + $0x50] sm:$0xff]  ;;  %v493_v35 = vld [vmem:[%s4361_s5 + $0xe0] sm:$0xff] }
  0x38   :  { %1749 = vmatpush1.bf16.msra.mxu1 %v1748_v45  ;;  %v280_v44 = vld [vmem:[%s4359_s3 + $0x3f8] sm:$0xff]  ;;  %v273_v45 = vld [vmem:[%s4359_s3 + $0x3c0] sm:$0xff]  ;;  %v467_v6 = vld [vmem:[%s4361_s5 + $0x10] sm:$0xff] }
  0x39   :  { %1789 = vmatpush1.bf16.msra.mxu0 %v1788_v28  ;;  %1751 = vmatprep.subr.bf16.mxu1 %v1750_v47  ;;  %v259_v28 = vld [vmem:[%s4359_s3 + $0x350] sm:$0xff]  ;;  %v1826_v47 = vpack.c.bf16 %v280_v44, %v276_v42  ;;  %v1764_v3 = vpack.c.bf16 %v277_v46, %v273_v45  ;;  %v468_v53 = vld [vmem:[%s4361_s5 + $0x18] sm:$0xff]  ;;  %v517_v44 = vld [vmem:[%s4361_s5 + $0x1a0] sm:$0xff] }
  0x3a   :  { %1791 = vmatprep.subr.bf16.mxu0 %v1790_v29  ;;  %v263_v29 = vld [vmem:[%s4359_s3 + $0x370] sm:$0xff]  ;;  %v472_v2 = vld [vmem:[%s4361_s5 + $0x38] sm:$0xff] }
  0x3b   :  { %v1820_v32 = vpack.c.bf16 %v263_v29, %v259_v28  ;;  %v487_v10 = vld [vmem:[%s4361_s5 + $0xb0] sm:$0xff]  ;;  %v488_v25 = vld [vmem:[%s4361_s5 + $0xb8] sm:$0xff]  ;;  %v501_v28 = vld [vmem:[%s4361_s5 + $0x120] sm:$0xff] }
  0x3c   :  { %1753 = vmatpush1.bf16.msra.mxu1 %v1752_v56  ;;  %v1958_v56 = vpack.c.bf16 %v475_v55, %v468_v53  ;;  %v479_v17 = vld [vmem:[%s4361_s5 + $0x70] sm:$0xff]  ;;  %v496_v29 = vld [vmem:[%s4361_s5 + $0xf8] sm:$0xff]  ;;  %v1964_v34 = vpack.c.bf16 %v488_v25, %v481_v24  ;;  %v529_v53 = vld [vmem:[%s4361_s5 + $0x200] sm:$0xff] }
  0x3d   :  { %1793 = vmatpush1.bf16.msra.mxu0 %v1792_v40  ;;  %1755 = vmatprep.subr.bf16.mxu1 %v1754_v58  ;;  %v274_v40 = vld [vmem:[%s4359_s3 + $0x3c8] sm:$0xff]  ;;  %v2872_v58 = vshrl.u32 %v62_v57, 7  ;;  %v503_v30 = vld [vmem:[%s4361_s5 + $0x130] sm:$0xff]  ;;  %v500_v36 = vld [vmem:[%s4361_s5 + $0x118] sm:$0xff] }
  0x3e   :  { %1795 = vmatprep.subr.bf16.mxu0 %v1794_v41  ;;  %v278_v41 = vld [vmem:[%s4359_s3 + $0x3e8] sm:$0xff]  ;;  %v1966_v38 = vpack.c.bf16 %v503_v30, %v496_v29  ;;  %v515_v42 = vld [vmem:[%s4361_s5 + $0x190] sm:$0xff]  ;;  %v1840_v45 = vpack.c.bf16 %v500_v36, %v493_v35 }
  0x3f   :  { %v1762_v43 = vpack.c.bf16 %v278_v41, %v274_v40  ;;  %v2875_v59 = vsub.s32 0, %v2872_v58  ;;  %v2881_v61 = vsub.s32 1, %v2872_v58  ;;  %v502_v40 = vld [vmem:[%s4361_s5 + $0x128] sm:$0xff]  ;;  %v508_v41 = vld [vmem:[%s4361_s5 + $0x158] sm:$0xff]  ;;  %v531_v55 = vld [vmem:[%s4361_s5 + $0x210] sm:$0xff] }
  0x40   :  { %1757 = vmatpush1.bf16.msra.mxu1 %v1756_v4  ;;  %v1842_v48 = vpack.c.bf16 %v515_v42, %v508_v41  ;;  %v571_v29 = vld [vmem:[%s4361_s5 + $0x350] sm:$0xff]  ;;  %v566_v30 = vld [vmem:[%s4361_s5 + $0x328] sm:$0xff]  ;;  %v585_v41 = vld [vmem:[%s4361_s5 + $0x3c0] sm:$0xff] }
  0x41   :  { %1797 = vmatpush1.bf16.msra.mxu0 %v1796_v51  ;;  %1759 = vmatprep.subr.bf16.mxu1 %v1758_v7  ;;  %v466_v51 = vld [vmem:[%s4361_s5 + $0x8] sm:$0xff]  ;;  %v65_v62 = vrot.slane %v60_v60, %v2875_v59  ;;  %v580_v42 = vld [vmem:[%s4361_s5 + $0x398] sm:$0xff] }
  0x42   :  { %1799 = vmatprep.subr.bf16.mxu0 %v1798_v52  ;;  %v473_v52 = vld [vmem:[%s4361_s5 + $0x40] sm:$0xff]  ;;  %v474_v7 = vld [vmem:[%s4361_s5 + $0x48] sm:$0xff] }
  0x43   :  { %v1830_v54 = vpack.c.bf16 %v473_v52, %v466_v51  ;;  %v1960_v16 = vpack.c.bf16 %v474_v7, %v467_v6  ;;  %v516_v51 = vld [vmem:[%s4361_s5 + $0x198] sm:$0xff]  ;;  %v522_v52 = vld [vmem:[%s4361_s5 + $0x1c8] sm:$0xff]  ;;  %v545_v7 = vld [vmem:[%s4361_s5 + $0x280] sm:$0xff] }
  0x44   :  { %1761 = vmatpush1.bf16.msra.mxu1 %v1760_v37  ;;  %v538_v6 = vld [vmem:[%s4361_s5 + $0x248] sm:$0xff] }
  0x45   :  { %1801 = vmatpush1.bf16.msra.mxu0 %v1800_v63  ;;  %1763 = vmatprep.subr.bf16.mxu1 %v1762_v43  ;;  %v69_v63 = vrot.slane %v60_v60, %v2881_v61  ;;  %v510_v43 = vld [vmem:[%s4361_s5 + $0x168] sm:$0xff]  ;;  %v521_v60 = vld [vmem:[%s4361_s5 + $0x1c0] sm:$0xff] }
  0x46   :  { %1803 = vmatprep.subr.bf16.mxu0 %v1802_v0  ;;  %v1970_v49 = vpack.c.bf16 %v517_v44, %v510_v43  ;;  %v570_v35 = vld [vmem:[%s4361_s5 + $0x348] sm:$0xff]  ;;  %v587_v43 = vld [vmem:[%s4361_s5 + $0x3d0] sm:$0xff] }
  0x48   :  { %1765 = vmatpush1.bf16.msra.mxu1 %v1764_v3  ;;  %v514_v3 = vld [vmem:[%s4361_s5 + $0x188] sm:$0xff] }
  0x49   :  { %1805 = vmatpush1.bf16.msra.mxu0 %v1804_v8  ;;  %1831 = vmatprep.subr.bf16.mxu1 %v1830_v54  ;;  %v480_v8 = vld [vmem:[%s4361_s5 + $0x78] sm:$0xff] }
  0x4a   :  { %1807 = vmatprep.subr.bf16.mxu0 %v1806_v9  ;;  %v1834_v22 = vpack.c.bf16 %v487_v10, %v480_v8  ;;  %v524_v54 = vld [vmem:[%s4361_s5 + $0x1d8] sm:$0xff]  ;;  %v535_v10 = vld [vmem:[%s4361_s5 + $0x230] sm:$0xff] }
  0x4d   :  { %1809 = vmatpush1.bf16.msra.mxu0 %v1808_v14 }
  0x4e   :  { %1811 = vmatprep.subr.bf16.mxu0 %v1810_v15  ;;  %v1832_v15 = vpack.c.bf16 %v472_v2, %v465_v1  ;;  %v523_v1 = vld [vmem:[%s4361_s5 + $0x1d0] sm:$0xff]  ;;  %v530_v2 = vld [vmem:[%s4361_s5 + $0x208] sm:$0xff] }
  0x51   :  { %1813 = vmatpush1.bf16.msra.mxu0 %v1812_v20 }
  0x52   :  { %1815 = vmatprep.subr.bf16.mxu0 %v1814_v21 }
  0x55   :  { %1817 = vmatpush1.bf16.msra.mxu0 %v1816_v26  ;;  %v494_v26 = vld [vmem:[%s4361_s5 + $0xe8] sm:$0xff] }
  0x56   :  { %1819 = vmatprep.subr.bf16.mxu0 %v1818_v27  ;;  %v1838_v37 = vpack.c.bf16 %v501_v28, %v494_v26  ;;  %v551_v26 = vld [vmem:[%s4361_s5 + $0x2b0] sm:$0xff]  ;;  %v564_v28 = vld [vmem:[%s4361_s5 + $0x318] sm:$0xff] }
  0x57   :  { %v1858_v36 = vpack.c.bf16 %v571_v29, %v564_v28  ;;  %v641_v28 = vld [vmem:[%s4361_s5 + $0x580] sm:$0xff]  ;;  %v636_v29 = vld [vmem:[%s4361_s5 + $0x558] sm:$0xff] }
  0x59   :  { %1821 = vmatpush1.bf16.msra.mxu0 %v1820_v32 }
  0x5a   :  { %1823 = vmatprep.subr.bf16.mxu0 %v1822_v33  ;;  %v1836_v33 = vpack.c.bf16 %v486_v18, %v479_v17  ;;  %v557_v17 = vld [vmem:[%s4361_s5 + $0x2e0] sm:$0xff]  ;;  %v552_v18 = vld [vmem:[%s4361_s5 + $0x2b8] sm:$0xff] }
  0x5d   :  { %1825 = vmatpush1.bf16.msra.mxu0 %v1824_v39  ;;  %v495_v39 = vld [vmem:[%s4361_s5 + $0xf0] sm:$0xff] }
  0x5e   :  { %1827 = vmatprep.subr.bf16.mxu0 %v1826_v47  ;;  %v1968_v46 = vpack.c.bf16 %v502_v40, %v495_v39  ;;  %v507_v47 = vld [vmem:[%s4361_s5 + $0x150] sm:$0xff]  ;;  %v572_v39 = vld [vmem:[%s4361_s5 + $0x358] sm:$0xff]  ;;  %v578_v40 = vld [vmem:[%s4361_s5 + $0x388] sm:$0xff] }
  0x61   :  { %1829 = vmatpush1.bf16.msra.mxu0 %v1828_v50  ;;  %v509_v50 = vld [vmem:[%s4361_s5 + $0x160] sm:$0xff] }
  0x62   :  { %1959 = vmatprep.subr.bf16.mxu0 %v1958_v56  ;;  %v1844_v56 = vpack.c.bf16 %v514_v3, %v507_v47  ;;  %v1972_v57 = vpack.c.bf16 %v516_v51, %v509_v50  ;;  %v584_v47 = vld [vmem:[%s4361_s5 + $0x3b8] sm:$0xff]  ;;  %v1862_v3 = vpack.c.bf16 %v585_v41, %v578_v40  ;;  %v586_v50 = vld [vmem:[%s4361_s5 + $0x3c8] sm:$0xff]  ;;  %v655_v40 = vld [vmem:[%s4361_s5 + $0x5f0] sm:$0xff] }
  0x63   :  { %v592_v51 = vld [vmem:[%s4361_s5 + $0x3f8] sm:$0xff]  ;;  %v650_v41 = vld [vmem:[%s4361_s5 + $0x5c8] sm:$0xff] }
  0xf7   :  { %v138_v0 = vpop.f32.mrb[0].mxu0 }
  0xf8   :  { %v139_v4 = vadd.f32 %v138_v0, %v65_v62  ;;  %v140_v5 = vpop.f32.mrb[1].mxu0  ;;  %v1974_v0 = vpack.c.bf16 %v531_v55, %v524_v54  ;;  %v601_v54 = vld [vmem:[%s4361_s5 + $0x440] sm:$0xff] }
  0xf9   :  { %v141_v9 = vadd.f32 %v140_v5, %v69_v63  ;;  %v543_v5 = vld [vmem:[%s4361_s5 + $0x270] sm:$0xff] }
  0xfa   :  { %v149_v19 = vmax.f32 %v139_v4, 0.0  ;;  %v536_v4 = vld [vmem:[%s4361_s5 + $0x238] sm:$0xff] }
  0xfb   :  { %v150_v13 = vmax.f32 %v141_v9, 0.0  ;;  %v144_v14 = vpop.f32.mrb[2].mxu0  ;;  %v1976_v9 = vpack.c.bf16 %v530_v2, %v523_v1  ;;  %v1850_v12 = vpack.c.bf16 %v543_v5, %v536_v4  ;;  %v600_v1 = vld [vmem:[%s4361_s5 + $0x438] sm:$0xff]  ;;  %v606_v2 = vld [vmem:[%s4361_s5 + $0x468] sm:$0xff]  ;;  %v613_v4 = vld [vmem:[%s4361_s5 + $0x4a0] sm:$0xff] }
  0xfc   :  { %v145_v20 = vadd.f32 %v144_v14, %v65_v62  ;;  %v146_v21 = vpop.f32.mrb[3].mxu0  ;;  %v528_v62 = vld [vmem:[%s4361_s5 + $0x1f8] sm:$0xff]  ;;  %v537_v14 = vld [vmem:[%s4361_s5 + $0x240] sm:$0xff] }
  0xfd   :  { %v147_v27 = vadd.f32 %v146_v21, %v69_v63  ;;  %367 = vmatprep.mubr.f32.mxu1 %v150_v13  ;;  %444 = vmatprep.mubr.f32.mxu0 %v150_v13  ;;  %v1846_v63 = vpack.c.bf16 %v529_v53, %v522_v52  ;;  %v1848_v8 = vpack.c.bf16 %v528_v62, %v521_v60  ;;  %v599_v52 = vld [vmem:[%s4361_s5 + $0x430] sm:$0xff]  ;;  %v594_v53 = vld [vmem:[%s4361_s5 + $0x408] sm:$0xff]  ;;  %v608_v5 = vld [vmem:[%s4361_s5 + $0x478] sm:$0xff] }
  0xfe   :  { %v151_v31 = vmax.f32 %v145_v20, 0.0  ;;  %368 = vmatmul.mubr.f32.vlgmr.msra.gmra.mrb[0].mxu1 %v149_v19  ;;  %445 = vmatmul.mubr.f32.vlgmr.msra.gmra.mrb[4].mxu0 %v149_v19  ;;  %v1978_v13 = vpack.c.bf16 %v545_v7, %v538_v6  ;;  %v559_v19 = vld [vmem:[%s4361_s5 + $0x2f0] sm:$0xff]  ;;  %v1852_v20 = vpack.c.bf16 %v542_v11, %v535_v10  ;;  %v598_v60 = vld [vmem:[%s4361_s5 + $0x428] sm:$0xff]  ;;  %v1866_v62 = vpack.c.bf16 %v599_v52, %v592_v51  ;;  %v612_v10 = vld [vmem:[%s4361_s5 + $0x498] sm:$0xff] }
  0xff   :  { %v152_v32 = vmax.f32 %v147_v27, 0.0  ;;  %1833 = vmatpush1.bf16.msra.mxu1 %v1832_v15  ;;  %1961 = vmatpush1.bf16.msra.mxu0 %v1960_v16  ;;  %v544_v15 = vld [vmem:[%s4361_s5 + $0x278] sm:$0xff]  ;;  %v550_v16 = vld [vmem:[%s4361_s5 + $0x2a8] sm:$0xff]  ;;  %v1982_v25 = vpack.c.bf16 %v559_v19, %v552_v18  ;;  %v615_v6 = vld [vmem:[%s4361_s5 + $0x4b0] sm:$0xff]  ;;  %v1870_v11 = vpack.c.bf16 %v613_v4, %v606_v2 }
 0x100   :  { %1835 = vmatprep.subr.bf16.mxu1 %v1834_v22  ;;  %1963 = vmatprep.subr.bf16.mxu0 %v1962_v23  ;;  %v1980_v21 = vpack.c.bf16 %v544_v15, %v537_v14  ;;  %v549_v22 = vld [vmem:[%s4361_s5 + $0x2a0] sm:$0xff]  ;;  %v556_v23 = vld [vmem:[%s4361_s5 + $0x2d8] sm:$0xff]  ;;  %v1854_v24 = vpack.c.bf16 %v557_v17, %v550_v16  ;;  %v558_v27 = vld [vmem:[%s4361_s5 + $0x2e8] sm:$0xff] }
 0x101   :  { %373 = vmatprep.mubr.f32.mxu1 %v152_v32  ;;  %450 = vmatprep.mubr.f32.mxu0 %v152_v32  ;;  %v1856_v32 = vpack.c.bf16 %v556_v23, %v549_v22  ;;  %v614_v14 = vld [vmem:[%s4361_s5 + $0x4a8] sm:$0xff]  ;;  %v620_v15 = vld [vmem:[%s4361_s5 + $0x4d8] sm:$0xff]  ;;  %v627_v16 = vld [vmem:[%s4361_s5 + $0x510] sm:$0xff] }
 0x102   :  { %374 = vmatmul.mubr.f32.gmra.mrb[2].mxu1 %v151_v31  ;;  %451 = vmatmul.mubr.f32.gmra.mrb[6].mxu0 %v151_v31  ;;  %v573_v31 = vld [vmem:[%s4361_s5 + $0x360] sm:$0xff]  ;;  %v622_v17 = vld [vmem:[%s4361_s5 + $0x4e8] sm:$0xff]  ;;  %v1874_v23 = vpack.c.bf16 %v627_v16, %v620_v15  ;;  %v664_v52 = vld [vmem:[%s4361_s5 + $0x638] sm:$0xff] }
 0x103   :  { %1837 = vmatpush1.bf16.msra.mxu1 %v1836_v33  ;;  %1965 = vmatpush1.bf16.msra.mxu0 %v1964_v34  ;;  %v1984_v33 = vpack.c.bf16 %v558_v27, %v551_v26  ;;  %v563_v34 = vld [vmem:[%s4361_s5 + $0x310] sm:$0xff]  ;;  %v629_v18 = vld [vmem:[%s4361_s5 + $0x520] sm:$0xff]  ;;  %v626_v22 = vld [vmem:[%s4361_s5 + $0x508] sm:$0xff] }
 0x104   :  { %1839 = vmatprep.subr.bf16.mxu1 %v1838_v37  ;;  %1967 = vmatprep.subr.bf16.mxu0 %v1966_v38  ;;  %v1986_v37 = vpack.c.bf16 %v573_v31, %v566_v30  ;;  %v565_v38 = vld [vmem:[%s4361_s5 + $0x320] sm:$0xff]  ;;  %v1860_v44 = vpack.c.bf16 %v570_v35, %v563_v34  ;;  %v628_v26 = vld [vmem:[%s4361_s5 + $0x518] sm:$0xff]  ;;  %v634_v27 = vld [vmem:[%s4361_s5 + $0x548] sm:$0xff] }
 0x105   :  { %v643_v30 = vld [vmem:[%s4361_s5 + $0x590] sm:$0xff]  ;;  %v640_v34 = vld [vmem:[%s4361_s5 + $0x578] sm:$0xff]  ;;  %v1878_v35 = vpack.c.bf16 %v641_v28, %v634_v27  ;;  %v669_v51 = vld [vmem:[%s4361_s5 + $0x660] sm:$0xff] }
 0x106   :  { %v676_v4 = vld [vmem:[%s4361_s5 + $0x698] sm:$0xff]  ;;  %v690_v16 = vld [vmem:[%s4361_s5 + $0x708] sm:$0xff]  ;;  %v689_v28 = vld [vmem:[%s4361_s5 + $0x700] sm:$0xff] }
 0x107   :  { %1841 = vmatpush1.bf16.msra.mxu1 %v1840_v45  ;;  %1969 = vmatpush1.bf16.msra.mxu0 %v1968_v46  ;;  %v1988_v45 = vpack.c.bf16 %v572_v39, %v565_v38  ;;  %v577_v46 = vld [vmem:[%s4361_s5 + $0x380] sm:$0xff]  ;;  %v642_v38 = vld [vmem:[%s4361_s5 + $0x588] sm:$0xff]  ;;  %v648_v39 = vld [vmem:[%s4361_s5 + $0x5b8] sm:$0xff] }
 0x108   :  { %1843 = vmatprep.subr.bf16.mxu1 %v1842_v48  ;;  %1971 = vmatprep.subr.bf16.mxu0 %v1970_v49  ;;  %v1990_v48 = vpack.c.bf16 %v587_v43, %v580_v42  ;;  %v579_v49 = vld [vmem:[%s4361_s5 + $0x390] sm:$0xff]  ;;  %v1864_v55 = vpack.c.bf16 %v584_v47, %v577_v46  ;;  %v657_v42 = vld [vmem:[%s4361_s5 + $0x600] sm:$0xff]  ;;  %v654_v46 = vld [vmem:[%s4361_s5 + $0x5e8] sm:$0xff]  ;;  %v1882_v47 = vpack.c.bf16 %v655_v40, %v648_v39 }
 0x109   :  { %v713_v39 = vld [vmem:[%s4361_s5 + $0x7c0] sm:$0xff] }
 0x10b   :  { %1845 = vmatpush1.bf16.msra.mxu1 %v1844_v56  ;;  %1973 = vmatpush1.bf16.msra.mxu0 %v1972_v57  ;;  %v1992_v56 = vpack.c.bf16 %v586_v50, %v579_v49  ;;  %v591_v57 = vld [vmem:[%s4361_s5 + $0x3f0] sm:$0xff]  ;;  %v656_v49 = vld [vmem:[%s4361_s5 + $0x5f8] sm:$0xff]  ;;  %v662_v50 = vld [vmem:[%s4361_s5 + $0x628] sm:$0xff] }
 0x10c   :  { %1847 = vmatprep.subr.bf16.mxu1 %v1846_v63  ;;  %1975 = vmatprep.subr.bf16.mxu0 %v1974_v0  ;;  %v1994_v63 = vpack.c.bf16 %v601_v54, %v594_v53  ;;  %v593_v0 = vld [vmem:[%s4361_s5 + $0x400] sm:$0xff]  ;;  %v1868_v7 = vpack.c.bf16 %v598_v60, %v591_v57  ;;  %v671_v53 = vld [vmem:[%s4361_s5 + $0x670] sm:$0xff]  ;;  %v1886_v57 = vpack.c.bf16 %v669_v51, %v662_v50  ;;  %v710_v51 = vld [vmem:[%s4361_s5 + $0x7a8] sm:$0xff] }
 0x10d   :  { %v2014_v60 = vpack.c.bf16 %v671_v53, %v664_v52  ;;  %v705_v52 = vld [vmem:[%s4361_s5 + $0x780] sm:$0xff]  ;;  %v712_v53 = vld [vmem:[%s4361_s5 + $0x7b8] sm:$0xff] }
 0x10f   :  { %1849 = vmatpush1.bf16.msra.mxu1 %v1848_v8  ;;  %1977 = vmatpush1.bf16.msra.mxu0 %v1976_v9  ;;  %v1996_v8 = vpack.c.bf16 %v600_v1, %v593_v0  ;;  %v605_v9 = vld [vmem:[%s4361_s5 + $0x460] sm:$0xff]  ;;  %v670_v0 = vld [vmem:[%s4361_s5 + $0x668] sm:$0xff] }
 0x110   :  { %1851 = vmatprep.subr.bf16.mxu1 %v1850_v12  ;;  %1979 = vmatprep.subr.bf16.mxu0 %v1978_v13  ;;  %v1998_v12 = vpack.c.bf16 %v615_v6, %v608_v5  ;;  %v607_v13 = vld [vmem:[%s4361_s5 + $0x470] sm:$0xff]  ;;  %v1872_v19 = vpack.c.bf16 %v612_v10, %v605_v9  ;;  %v678_v6 = vld [vmem:[%s4361_s5 + $0x6a8] sm:$0xff] }
 0x111   :  { %v683_v5 = vld [vmem:[%s4361_s5 + $0x6d0] sm:$0xff]  ;;  %v682_v10 = vld [vmem:[%s4361_s5 + $0x6c8] sm:$0xff] }
 0x112   :  { %v675_v9 = vld [vmem:[%s4361_s5 + $0x690] sm:$0xff] }
 0x113   :  { %1853 = vmatpush1.bf16.msra.mxu1 %v1852_v20  ;;  %1981 = vmatpush1.bf16.msra.mxu0 %v1980_v21  ;;  %v2000_v20 = vpack.c.bf16 %v614_v14, %v607_v13  ;;  %v619_v21 = vld [vmem:[%s4361_s5 + $0x4d0] sm:$0xff]  ;;  %v677_v13 = vld [vmem:[%s4361_s5 + $0x6a0] sm:$0xff]  ;;  %v684_v14 = vld [vmem:[%s4361_s5 + $0x6d8] sm:$0xff] }
 0x114   :  { %1855 = vmatprep.subr.bf16.mxu1 %v1854_v24  ;;  %1983 = vmatprep.subr.bf16.mxu0 %v1982_v25  ;;  %v2002_v24 = vpack.c.bf16 %v629_v18, %v622_v17  ;;  %v621_v25 = vld [vmem:[%s4361_s5 + $0x4e0] sm:$0xff]  ;;  %v1876_v31 = vpack.c.bf16 %v626_v22, %v619_v21  ;;  %v2020_v15 = vpack.c.bf16 %v684_v14, %v677_v13  ;;  %v692_v18 = vld [vmem:[%s4361_s5 + $0x718] sm:$0xff]  ;;  %v734_v13 = vld [vmem:[%s4361_s5 + $0x868] sm:$0xff] }
 0x115   :  { %v697_v17 = vld [vmem:[%s4361_s5 + $0x740] sm:$0xff] }
 0x116   :  { %v3272_v22 = vld [vmem:[%s4363_s4] sm:$0xf] }
 0x117   :  { %1857 = vmatpush1.bf16.msra.mxu1 %v1856_v32  ;;  %1985 = vmatpush1.bf16.msra.mxu0 %v1984_v33  ;;  %v2004_v32 = vpack.c.bf16 %v628_v26, %v621_v25  ;;  %v633_v33 = vld [vmem:[%s4361_s5 + $0x540] sm:$0xff]  ;;  %v297_v25 = vsub.s32 3, %v2872_v58 }
 0x118   :  { %1859 = vmatprep.subr.bf16.mxu1 %v1858_v36  ;;  %1987 = vmatprep.subr.bf16.mxu0 %v1986_v37  ;;  %v2006_v36 = vpack.c.bf16 %v643_v30, %v636_v29  ;;  %v635_v37 = vld [vmem:[%s4361_s5 + $0x550] sm:$0xff]  ;;  %v1880_v43 = vpack.c.bf16 %v640_v34, %v633_v33  ;;  %v696_v29 = vld [vmem:[%s4361_s5 + $0x738] sm:$0xff]  ;;  %v698_v34 = vld [vmem:[%s4361_s5 + $0x748] sm:$0xff] }
 0x119   :  { %v691_v33 = vld [vmem:[%s4361_s5 + $0x710] sm:$0xff]  ;;  %v3308_v40 = vrot.slane %v3272_v22, %v297_v25  ;;  %v741_v14 = vld [vmem:[%s4361_s5 + $0x8a0] sm:$0xff] }
 0x11b   :  { %1861 = vmatpush1.bf16.msra.mxu1 %v1860_v44  ;;  %1989 = vmatpush1.bf16.msra.mxu0 %v1988_v45  ;;  %v2008_v44 = vpack.c.bf16 %v642_v38, %v635_v37  ;;  %v647_v45 = vld [vmem:[%s4361_s5 + $0x5b0] sm:$0xff]  ;;  %v706_v38 = vld [vmem:[%s4361_s5 + $0x788] sm:$0xff] }
 0x11c   :  { %1863 = vmatprep.subr.bf16.mxu1 %v1862_v3  ;;  %1991 = vmatprep.subr.bf16.mxu0 %v1990_v48  ;;  %v2010_v3 = vpack.c.bf16 %v657_v42, %v650_v41  ;;  %v649_v48 = vld [vmem:[%s4361_s5 + $0x5c0] sm:$0xff]  ;;  %v1884_v54 = vpack.c.bf16 %v654_v46, %v647_v45  ;;  %v711_v37 = vld [vmem:[%s4361_s5 + $0x7b0] sm:$0xff]  ;;  %v2026_v50 = vpack.c.bf16 %v713_v39, %v706_v38  ;;  %v754_v38 = vld [vmem:[%s4361_s5 + $0x908] sm:$0xff] }
 0x11d   :  { %v703_v45 = vld [vmem:[%s4361_s5 + $0x770] sm:$0xff]  ;;  %v760_v39 = vld [vmem:[%s4361_s5 + $0x938] sm:$0xff] }
 0x11f   :  { %1865 = vmatpush1.bf16.msra.mxu1 %v1864_v55  ;;  %1993 = vmatpush1.bf16.msra.mxu0 %v1992_v56  ;;  %v2012_v55 = vpack.c.bf16 %v656_v49, %v649_v48  ;;  %v661_v56 = vld [vmem:[%s4361_s5 + $0x620] sm:$0xff] }
 0x120   :  { %1867 = vmatprep.subr.bf16.mxu1 %v1866_v62  ;;  %1995 = vmatprep.subr.bf16.mxu0 %v1994_v63  ;;  %v668_v62 = vld [vmem:[%s4361_s5 + $0x658] sm:$0xff]  ;;  %v663_v63 = vld [vmem:[%s4361_s5 + $0x630] sm:$0xff] }
 0x121   :  { %v1888_v1 = vpack.c.bf16 %v668_v62, %v661_v56  ;;  %v2016_v2 = vpack.c.bf16 %v670_v0, %v663_v63  ;;  %v718_v56 = vld [vmem:[%s4361_s5 + $0x7e8] sm:$0xff]  ;;  %v725_v62 = vld [vmem:[%s4361_s5 + $0x820] sm:$0xff]  ;;  %v720_v63 = vld [vmem:[%s4361_s5 + $0x7f8] sm:$0xff] }
 0x122   :  { %v727_v0 = vld [vmem:[%s4361_s5 + $0x830] sm:$0xff] }
 0x123   :  { %1869 = vmatpush1.bf16.msra.mxu1 %v1868_v7  ;;  %1997 = vmatpush1.bf16.msra.mxu0 %v1996_v8  ;;  %v1890_v7 = vpack.c.bf16 %v683_v5, %v676_v4  ;;  %v685_v8 = vld [vmem:[%s4361_s5 + $0x6e0] sm:$0xff]  ;;  %v2028_v4 = vpack.c.bf16 %v712_v53, %v705_v52  ;;  %v768_v53 = vld [vmem:[%s4361_s5 + $0x978] sm:$0xff] }
 0x124   :  { %1871 = vmatprep.subr.bf16.mxu1 %v1870_v11  ;;  %1999 = vmatprep.subr.bf16.mxu0 %v1998_v12  ;;  %v2018_v11 = vpack.c.bf16 %v685_v8, %v678_v6  ;;  %v1892_v12 = vpack.c.bf16 %v682_v10, %v675_v9  ;;  %v717_v5 = vld [vmem:[%s4361_s5 + $0x7e0] sm:$0xff]  ;;  %v724_v6 = vld [vmem:[%s4361_s5 + $0x818] sm:$0xff]  ;;  %v726_v8 = vld [vmem:[%s4361_s5 + $0x828] sm:$0xff]  ;;  %v1902_v10 = vpack.c.bf16 %v725_v62, %v718_v56 }
 0x125   :  { %v732_v9 = vld [vmem:[%s4361_s5 + $0x858] sm:$0xff]  ;;  %v761_v52 = vld [vmem:[%s4361_s5 + $0x940] sm:$0xff]  ;;  %v783_v62 = vld [vmem:[%s4361_s5 + $0x9f0] sm:$0xff] }
 0x126   :  { %v781_v56 = vld [vmem:[%s4361_s5 + $0x9e0] sm:$0xff] }
 0x127   :  { %1873 = vmatpush1.bf16.msra.mxu1 %v1872_v19  ;;  %2001 = vmatpush1.bf16.msra.mxu0 %v2000_v20  ;;  %v1894_v19 = vpack.c.bf16 %v697_v17, %v690_v16  ;;  %v699_v20 = vld [vmem:[%s4361_s5 + $0x750] sm:$0xff]  ;;  %v1904_v16 = vpack.c.bf16 %v724_v6, %v717_v5 }
 0x128   :  { %1875 = vmatprep.subr.bf16.mxu1 %v1874_v23  ;;  %2003 = vmatprep.subr.bf16.mxu0 %v2002_v24  ;;  %v2022_v21 = vpack.c.bf16 %v699_v20, %v692_v18  ;;  %v286_v23 = vrot.slane %v3272_v22, %v2875_v59  ;;  %v290_v24 = vrot.slane %v3272_v22, %v2881_v61  ;;  %v731_v18 = vld [vmem:[%s4361_s5 + $0x850] sm:$0xff] }
 0x12b   :  { %1877 = vmatpush1.bf16.msra.mxu1 %v1876_v31  ;;  %2005 = vmatpush1.bf16.msra.mxu0 %v2004_v32 }
 0x12c   :  { %1879 = vmatprep.subr.bf16.mxu1 %v1878_v35  ;;  %2007 = vmatprep.subr.bf16.mxu0 %v2006_v36  ;;  %v704_v35 = vld [vmem:[%s4361_s5 + $0x778] sm:$0xff] }
 0x12d   :  { %v1898_v49 = vpack.c.bf16 %v711_v37, %v704_v35  ;;  %v747_v37 = vld [vmem:[%s4361_s5 + $0x8d0] sm:$0xff] }
 0x12f   :  { %1881 = vmatpush1.bf16.msra.mxu1 %v1880_v43  ;;  %2009 = vmatpush1.bf16.msra.mxu0 %v2008_v44  ;;  %v1896_v43 = vpack.c.bf16 %v696_v29, %v689_v28  ;;  %v2024_v44 = vpack.c.bf16 %v698_v34, %v691_v33  ;;  %v753_v28 = vld [vmem:[%s4361_s5 + $0x900] sm:$0xff]  ;;  %v748_v29 = vld [vmem:[%s4361_s5 + $0x8d8] sm:$0xff] }
 0x130   :  { %1883 = vmatprep.subr.bf16.mxu1 %v1882_v47  ;;  %2011 = vmatprep.subr.bf16.mxu0 %v2010_v3  ;;  %v745_v33 = vld [vmem:[%s4361_s5 + $0x8c0] sm:$0xff]  ;;  %v752_v34 = vld [vmem:[%s4361_s5 + $0x8f8] sm:$0xff] }
 0x133   :  { %1885 = vmatpush1.bf16.msra.mxu1 %v1884_v54  ;;  %2013 = vmatpush1.bf16.msra.mxu0 %v2012_v55 }
 0x134   :  { %1887 = vmatprep.subr.bf16.mxu1 %v1886_v57  ;;  %2015 = vmatprep.subr.bf16.mxu0 %v2014_v60 }
 0x137   :  { %1889 = vmatpush1.bf16.msra.mxu1 %v1888_v1  ;;  %2017 = vmatpush1.bf16.msra.mxu0 %v2016_v2  ;;  %v1900_v2 = vpack.c.bf16 %v710_v51, %v703_v45  ;;  %v1912_v45 = vpack.c.bf16 %v752_v34, %v745_v33 }
 0x138   :  { %1891 = vmatprep.subr.bf16.mxu1 %v1890_v7  ;;  %2019 = vmatprep.subr.bf16.mxu0 %v2018_v11  ;;  %v719_v7 = vld [vmem:[%s4361_s5 + $0x7f0] sm:$0xff]  ;;  %v2030_v11 = vpack.c.bf16 %v727_v0, %v720_v63  ;;  %v2044_v0 = vpack.c.bf16 %v768_v53, %v761_v52  ;;  %v830_v52 = vld [vmem:[%s4361_s5 + $0xb68] sm:$0xff]  ;;  %v837_v53 = vld [vmem:[%s4361_s5 + $0xba0] sm:$0xff] }
 0x139   :  { %v2032_v17 = vpack.c.bf16 %v726_v8, %v719_v7  ;;  %v775_v7 = vld [vmem:[%s4361_s5 + $0x9b0] sm:$0xff]  ;;  %v782_v8 = vld [vmem:[%s4361_s5 + $0x9e8] sm:$0xff] }
 0x13b   :  { %1893 = vmatpush1.bf16.msra.mxu1 %v1892_v12  ;;  %2021 = vmatpush1.bf16.msra.mxu0 %v2020_v15  ;;  %v739_v12 = vld [vmem:[%s4361_s5 + $0x890] sm:$0xff] }
 0x13c   :  { %1895 = vmatprep.subr.bf16.mxu1 %v1894_v19  ;;  %2023 = vmatprep.subr.bf16.mxu0 %v2022_v21  ;;  %v738_v19 = vld [vmem:[%s4361_s5 + $0x888] sm:$0xff]  ;;  %v1906_v20 = vpack.c.bf16 %v739_v12, %v732_v9  ;;  %v2034_v21 = vpack.c.bf16 %v741_v14, %v734_v13  ;;  %v788_v9 = vld [vmem:[%s4361_s5 + $0xa18] sm:$0xff]  ;;  %v797_v12 = vld [vmem:[%s4361_s5 + $0xa60] sm:$0xff]  ;;  %v2048_v14 = vpack.c.bf16 %v782_v8, %v775_v7 }
 0x13d   :  { %v844_v7 = vld [vmem:[%s4361_s5 + $0xbd8] sm:$0xff]  ;;  %v851_v8 = vld [vmem:[%s4361_s5 + $0xc10] sm:$0xff] }
 0x1d1   :  { %v369_v26 = vpop.f32.mrb[0].mxu1  ;;  %v3279_v27 = vpop.f32.mrb[4].mxu0 }
 0x1d2   :  { %v370_v30 = vadd.f32 %v369_v26, %v286_v23  ;;  %v371_v31 = vpop.f32.mrb[1].mxu1  ;;  %v448_v32 = vpop.f32.mrb[5].mxu0  ;;  %v746_v26 = vld [vmem:[%s4361_s5 + $0x8c8] sm:$0xff] }
 0x1d3   :  { %v372_v36 = vadd.f32 %v371_v31, %v290_v24  ;;  %v449_v57 = vadd.f32 %v448_v32, %v3308_v40  ;;  %v1908_v31 = vpack.c.bf16 %v738_v19, %v731_v18  ;;  %v1910_v35 = vpack.c.bf16 %v753_v28, %v746_v26  ;;  %v804_v26 = vld [vmem:[%s4361_s5 + $0xa98] sm:$0xff]  ;;  %v811_v28 = vld [vmem:[%s4361_s5 + $0xad0] sm:$0xff] }
 0x1d4   :  { %v3317_v47 = vmax.f32 %v370_v30, 0.0  ;;  %v755_v30 = vld [vmem:[%s4361_s5 + $0x910] sm:$0xff]  ;;  %v2054_v34 = vpack.c.bf16 %v811_v28, %v804_v26 }
 0x1d5   :  { %v3310_v41 = vmax.f32 %v372_v36, 0.0  ;;  %v375_v42 = vpop.f32.mrb[2].mxu1  ;;  %v3315_v46 = vpop.f32.mrb[6].mxu0  ;;  %v3377_v15 = vmax.f32 %v449_v57, 0.0  ;;  %v2038_v36 = vpack.c.bf16 %v755_v30, %v748_v29  ;;  %v776_v57 = vld [vmem:[%s4361_s5 + $0x9b8] sm:$0xff] }
 0x1d6   :  { %v376_v3 = vadd.f32 %v375_v42, %v286_v23  ;;  %v377_v48 = vpop.f32.mrb[3].mxu1  ;;  %v3328_v54 = vpop.f32.mrb[7].mxu0  ;;  %v733_v23 = vld [vmem:[%s4361_s5 + $0x860] sm:$0xff]  ;;  %v767_v42 = vld [vmem:[%s4361_s5 + $0x970] sm:$0xff]  ;;  %v2046_v6 = vpack.c.bf16 %v783_v62, %v776_v57 }
 0x1d7   :  { %v378_v55 = vadd.f32 %v377_v48, %v290_v24  ;;  %1014 = vmatprep.mubr.f32.mxu1 %v3310_v41  ;;  %1168 = vmatprep.mubr.f32.mxu0 %v3310_v41  ;;  %v740_v24 = vld [vmem:[%s4361_s5 + $0x898] sm:$0xff]  ;;  %v759_v48 = vld [vmem:[%s4361_s5 + $0x930] sm:$0xff] }
 0x1d8   :  { %v3336_v60 = vmax.f32 %v376_v3, 0.0  ;;  %1015 = vmatmul.mubr.f32.vlgmr.msra.gmra.mrb[4].mxu1 %v3317_v47  ;;  %1169 = vmatmul.mubr.f32.vlgmr.msra.gmra.mrb[8].mxu0 %v3317_v47  ;;  %v2036_v32 = vpack.c.bf16 %v740_v24, %v733_v23  ;;  %v2040_v3 = vpack.c.bf16 %v754_v38, %v747_v37  ;;  %v802_v23 = vld [vmem:[%s4361_s5 + $0xa88] sm:$0xff]  ;;  %v809_v24 = vld [vmem:[%s4361_s5 + $0xac0] sm:$0xff]  ;;  %v816_v37 = vld [vmem:[%s4361_s5 + $0xaf8] sm:$0xff] }
 0x1d9   :  { %v3349_v1 = vmax.f32 %v378_v55, 0.0  ;;  %1897 = vmatpush1.bf16.msra.mxu1 %v1896_v43  ;;  %2025 = vmatpush1.bf16.msra.mxu0 %v2024_v44  ;;  %v762_v43 = vld [vmem:[%s4361_s5 + $0x948] sm:$0xff]  ;;  %v769_v44 = vld [vmem:[%s4361_s5 + $0x980] sm:$0xff]  ;;  %v1926_v33 = vpack.c.bf16 %v809_v24, %v802_v23  ;;  %v823_v38 = vld [vmem:[%s4361_s5 + $0xb30] sm:$0xff] }
 0x1da   :  { %1899 = vmatprep.subr.bf16.mxu1 %v1898_v49  ;;  %2027 = vmatprep.subr.bf16.mxu0 %v2026_v50  ;;  %v766_v49 = vld [vmem:[%s4361_s5 + $0x968] sm:$0xff]  ;;  %v1914_v50 = vpack.c.bf16 %v767_v42, %v760_v39  ;;  %v2042_v51 = vpack.c.bf16 %v769_v44, %v762_v43  ;;  %v825_v42 = vld [vmem:[%s4361_s5 + $0xb40] sm:$0xff]  ;;  %v860_v23 = vld [vmem:[%s4361_s5 + $0xc58] sm:$0xff] }
 0x1db   :  { %1020 = vmatprep.mubr.f32.mxu1 %v3349_v1  ;;  %1174 = vmatprep.mubr.f32.mxu0 %v3349_v1  ;;  %v774_v55 = vld [vmem:[%s4361_s5 + $0x9a8] sm:$0xff]  ;;  %v1916_v63 = vpack.c.bf16 %v766_v49, %v759_v48  ;;  %v1930_v48 = vpack.c.bf16 %v823_v38, %v816_v37  ;;  %v867_v24 = vld [vmem:[%s4361_s5 + $0xc90] sm:$0xff]  ;;  %v881_v38 = vld [vmem:[%s4361_s5 + $0xd00] sm:$0xff] }
 0x1dc   :  { %1021 = vmatmul.mubr.f32.gmra.mrb[6].mxu1 %v3336_v60  ;;  %1175 = vmatmul.mubr.f32.gmra.mrb[10].mxu0 %v3336_v60  ;;  %v1918_v5 = vpack.c.bf16 %v781_v56, %v774_v55  ;;  %v818_v39 = vld [vmem:[%s4361_s5 + $0xb08] sm:$0xff]  ;;  %v832_v55 = vld [vmem:[%s4361_s5 + $0xb78] sm:$0xff]  ;;  %v839_v56 = vld [vmem:[%s4361_s5 + $0xbb0] sm:$0xff] }
 0x1dd   :  { %1901 = vmatpush1.bf16.msra.mxu1 %v1900_v2  ;;  %2029 = vmatpush1.bf16.msra.mxu0 %v2028_v4  ;;  %v773_v2 = vld [vmem:[%s4361_s5 + $0x9a0] sm:$0xff]  ;;  %v780_v4 = vld [vmem:[%s4361_s5 + $0x9d8] sm:$0xff]  ;;  %v2058_v49 = vpack.c.bf16 %v825_v42, %v818_v39  ;;  %v874_v37 = vld [vmem:[%s4361_s5 + $0xcc8] sm:$0xff] }
 0x1de   :  { %1091 = vmatprep.mubr.f32.mxu1 %v3377_v15  ;;  %1245 = vmatprep.mubr.f32.mxu0 %v3377_v15  ;;  %v1920_v13 = vpack.c.bf16 %v780_v4, %v773_v2  ;;  %v1934_v2 = vpack.c.bf16 %v837_v53, %v830_v52  ;;  %v2062_v4 = vpack.c.bf16 %v839_v56, %v832_v55  ;;  %v888_v52 = vld [vmem:[%s4361_s5 + $0xd38] sm:$0xff]  ;;  %v895_v53 = vld [vmem:[%s4361_s5 + $0xd70] sm:$0xff] }
 0x1df   :  { %1903 = vmatprep.subr.bf16.mxu1 %v1902_v10  ;;  %2031 = vmatprep.subr.bf16.mxu0 %v2030_v11  ;;  %v795_v10 = vld [vmem:[%s4361_s5 + $0xa50] sm:$0xff]  ;;  %v790_v11 = vld [vmem:[%s4361_s5 + $0xa28] sm:$0xff] }
 0x1e0   :  { %v1922_v18 = vpack.c.bf16 %v795_v10, %v788_v9  ;;  %v2050_v19 = vpack.c.bf16 %v797_v12, %v790_v11  ;;  %v846_v9 = vld [vmem:[%s4361_s5 + $0xbe8] sm:$0xff]  ;;  %v853_v10 = vld [vmem:[%s4361_s5 + $0xc20] sm:$0xff] }
 0x1e1   :  { %1905 = vmatpush1.bf16.msra.mxu1 %v1904_v16  ;;  %2033 = vmatpush1.bf16.msra.mxu0 %v2032_v17  ;;  %v787_v16 = vld [vmem:[%s4361_s5 + $0xa10] sm:$0xff]  ;;  %v794_v17 = vld [vmem:[%s4361_s5 + $0xa48] sm:$0xff] }
 0x1e2   :  { %1907 = vmatprep.subr.bf16.mxu1 %v1906_v20  ;;  %2035 = vmatprep.subr.bf16.mxu0 %v2034_v21  ;;  %v789_v20 = vld [vmem:[%s4361_s5 + $0xa20] sm:$0xff]  ;;  %v796_v21 = vld [vmem:[%s4361_s5 + $0xa58] sm:$0xff]  ;;  %v1924_v29 = vpack.c.bf16 %v794_v17, %v787_v16  ;;  %v1938_v16 = vpack.c.bf16 %v851_v8, %v844_v7  ;;  %v2066_v17 = vpack.c.bf16 %v853_v10, %v846_v9  ;;  %v907_v7 = vld [vmem:[%s4361_s5 + $0xdd0] sm:$0xff] }
 0x1e3   :  { %v2052_v30 = vpack.c.bf16 %v796_v21, %v789_v20  ;;  %v858_v20 = vld [vmem:[%s4361_s5 + $0xc48] sm:$0xff]  ;;  %v865_v21 = vld [vmem:[%s4361_s5 + $0xc80] sm:$0xff] }
 0x1e4   :  { %v902_v8 = vld [vmem:[%s4361_s5 + $0xda8] sm:$0xff]  ;;  %v909_v9 = vld [vmem:[%s4361_s5 + $0xde0] sm:$0xff] }
 0x1e5   :  { %1909 = vmatpush1.bf16.msra.mxu1 %v1908_v31  ;;  %2037 = vmatpush1.bf16.msra.mxu0 %v2036_v32  ;;  %v801_v31 = vld [vmem:[%s4361_s5 + $0xa80] sm:$0xff]  ;;  %v808_v32 = vld [vmem:[%s4361_s5 + $0xab8] sm:$0xff] }
 0x1e6   :  { %1911 = vmatprep.subr.bf16.mxu1 %v1910_v35  ;;  %2039 = vmatprep.subr.bf16.mxu0 %v2038_v36  ;;  %v803_v35 = vld [vmem:[%s4361_s5 + $0xa90] sm:$0xff]  ;;  %v810_v36 = vld [vmem:[%s4361_s5 + $0xac8] sm:$0xff]  ;;  %v1928_v43 = vpack.c.bf16 %v808_v32, %v801_v31  ;;  %v1942_v31 = vpack.c.bf16 %v865_v21, %v858_v20  ;;  %v2070_v32 = vpack.c.bf16 %v867_v24, %v860_v23 }
 0x1e7   :  { %v2056_v44 = vpack.c.bf16 %v810_v36, %v803_v35  ;;  %v872_v35 = vld [vmem:[%s4361_s5 + $0xcb8] sm:$0xff]  ;;  %v879_v36 = vld [vmem:[%s4361_s5 + $0xcf0] sm:$0xff]  ;;  %v470_v20 = vld [vmem:[%s4361_s5 + $0x28] sm:$0xff] }
 0x1e8   :  { %v583_v21 = vld [vmem:[%s4361_s5 + $0x3b0] sm:$0xff]  ;;  %v590_v23 = vld [vmem:[%s4361_s5 + $0x3e8] sm:$0xff] }
 0x1e9   :  { %1913 = vmatpush1.bf16.msra.mxu1 %v1912_v45  ;;  %2041 = vmatpush1.bf16.msra.mxu0 %v2040_v3  ;;  %v815_v45 = vld [vmem:[%s4361_s5 + $0xaf0] sm:$0xff]  ;;  %v822_v3 = vld [vmem:[%s4361_s5 + $0xb28] sm:$0xff] }
 0x1ea   :  { %1915 = vmatprep.subr.bf16.mxu1 %v1914_v50  ;;  %2043 = vmatprep.subr.bf16.mxu0 %v2042_v51  ;;  %v817_v50 = vld [vmem:[%s4361_s5 + $0xb00] sm:$0xff]  ;;  %v824_v51 = vld [vmem:[%s4361_s5 + $0xb38] sm:$0xff]  ;;  %v1932_v57 = vpack.c.bf16 %v822_v3, %v815_v45  ;;  %v1946_v45 = vpack.c.bf16 %v879_v36, %v872_v35  ;;  %v2074_v3 = vpack.c.bf16 %v881_v38, %v874_v37  ;;  %v491_v36 = vld [vmem:[%s4361_s5 + $0xd0] sm:$0xff] }
 0x1eb   :  { %v2060_v62 = vpack.c.bf16 %v824_v51, %v817_v50  ;;  %v886_v50 = vld [vmem:[%s4361_s5 + $0xd28] sm:$0xff]  ;;  %v893_v51 = vld [vmem:[%s4361_s5 + $0xd60] sm:$0xff]  ;;  %v484_v35 = vld [vmem:[%s4361_s5 + $0x98] sm:$0xff] }
 0x1ed   :  { %1917 = vmatpush1.bf16.msra.mxu1 %v1916_v63  ;;  %2045 = vmatpush1.bf16.msra.mxu0 %v2044_v0  ;;  %v829_v63 = vld [vmem:[%s4361_s5 + $0xb60] sm:$0xff]  ;;  %v836_v0 = vld [vmem:[%s4361_s5 + $0xb98] sm:$0xff] }
 0x1ee   :  { %1919 = vmatprep.subr.bf16.mxu1 %v1918_v5  ;;  %2047 = vmatprep.subr.bf16.mxu0 %v2046_v6  ;;  %v831_v5 = vld [vmem:[%s4361_s5 + $0xb70] sm:$0xff]  ;;  %v838_v6 = vld [vmem:[%s4361_s5 + $0xba8] sm:$0xff]  ;;  %v1936_v11 = vpack.c.bf16 %v836_v0, %v829_v63  ;;  %v293_v63 = vsub.s32 2, %v2872_v58  ;;  %v1950_v0 = vpack.c.bf16 %v893_v51, %v886_v50  ;;  %v505_v51 = vld [vmem:[%s4361_s5 + $0x140] sm:$0xff] }
 0x1ef   :  { %v2064_v12 = vpack.c.bf16 %v838_v6, %v831_v5  ;;  %v894_v5 = vld [vmem:[%s4361_s5 + $0xd68] sm:$0xff]  ;;  %v900_v6 = vld [vmem:[%s4361_s5 + $0xd98] sm:$0xff] }
 0x1f0   :  { %v498_v50 = vld [vmem:[%s4361_s5 + $0x108] sm:$0xff] }
 0x1f1   :  { %1921 = vmatpush1.bf16.msra.mxu1 %v1920_v13  ;;  %2049 = vmatpush1.bf16.msra.mxu0 %v2048_v14  ;;  %v843_v13 = vld [vmem:[%s4361_s5 + $0xbd0] sm:$0xff]  ;;  %v850_v14 = vld [vmem:[%s4361_s5 + $0xc08] sm:$0xff] }
 0x1f2   :  { %1923 = vmatprep.subr.bf16.mxu1 %v1922_v18  ;;  %2051 = vmatprep.subr.bf16.mxu0 %v2050_v19  ;;  %v845_v18 = vld [vmem:[%s4361_s5 + $0xbe0] sm:$0xff]  ;;  %v852_v19 = vld [vmem:[%s4361_s5 + $0xc18] sm:$0xff]  ;;  %v1940_v26 = vpack.c.bf16 %v850_v14, %v843_v13  ;;  %v906_v13 = vld [vmem:[%s4361_s5 + $0xdc8] sm:$0xff]  ;;  %v294_v14 = vrot.slane %v3272_v22, %v293_v63 }
 0x1f3   :  { %v2068_v28 = vpack.c.bf16 %v852_v19, %v845_v18  ;;  %v901_v18 = vld [vmem:[%s4361_s5 + $0xda0] sm:$0xff]  ;;  %v908_v19 = vld [vmem:[%s4361_s5 + $0xdd8] sm:$0xff] }
 0x1f4   :  { %v477_v22 = vld [vmem:[%s4361_s5 + $0x60] sm:$0xff]  ;;  %v453_v38 = vadd.f32 %v3315_v46, %v294_v14 }
 0x1f5   :  { %1925 = vmatpush1.bf16.msra.mxu1 %v1924_v29  ;;  %2053 = vmatpush1.bf16.msra.mxu0 %v2052_v30  ;;  %v857_v29 = vld [vmem:[%s4361_s5 + $0xc40] sm:$0xff]  ;;  %v864_v30 = vld [vmem:[%s4361_s5 + $0xc78] sm:$0xff] }
 0x1f6   :  { %1927 = vmatprep.subr.bf16.mxu1 %v1926_v33  ;;  %2055 = vmatprep.subr.bf16.mxu0 %v2054_v34  ;;  %v859_v33 = vld [vmem:[%s4361_s5 + $0xc50] sm:$0xff]  ;;  %v866_v34 = vld [vmem:[%s4361_s5 + $0xc88] sm:$0xff]  ;;  %v1944_v39 = vpack.c.bf16 %v864_v30, %v857_v29  ;;  %v2086_v29 = vpack.c.bf16 %v477_v22, %v470_v20  ;;  %v2214_v30 = vpack.c.bf16 %v590_v23, %v583_v21  ;;  %v485_v46 = vld [vmem:[%s4361_s5 + $0xa0] sm:$0xff] }
 0x1f7   :  { %v2072_v42 = vpack.c.bf16 %v866_v34, %v859_v33  ;;  %v455_v33 = vadd.f32 %v3328_v54, %v3308_v40  ;;  %v471_v34 = vld [vmem:[%s4361_s5 + $0x30] sm:$0xff]  ;;  %v597_v40 = vld [vmem:[%s4361_s5 + $0x420] sm:$0xff]  ;;  %v604_v54 = vld [vmem:[%s4361_s5 + $0x458] sm:$0xff] }
 0x1f8   :  { %v533_v20 = vld [vmem:[%s4361_s5 + $0x220] sm:$0xff]  ;;  %v639_v22 = vld [vmem:[%s4361_s5 + $0x570] sm:$0xff]  ;;  %v646_v21 = vld [vmem:[%s4361_s5 + $0x5a8] sm:$0xff] }
 0x1f9   :  { %1929 = vmatpush1.bf16.msra.mxu1 %v1928_v43  ;;  %2057 = vmatpush1.bf16.msra.mxu0 %v2056_v44  ;;  %v871_v43 = vld [vmem:[%s4361_s5 + $0xcb0] sm:$0xff]  ;;  %v878_v44 = vld [vmem:[%s4361_s5 + $0xce8] sm:$0xff] }
 0x1fa   :  { %1931 = vmatprep.subr.bf16.mxu1 %v1930_v48  ;;  %2059 = vmatprep.subr.bf16.mxu0 %v2058_v49  ;;  %v873_v48 = vld [vmem:[%s4361_s5 + $0xcc0] sm:$0xff]  ;;  %v880_v49 = vld [vmem:[%s4361_s5 + $0xcf8] sm:$0xff]  ;;  %v1948_v55 = vpack.c.bf16 %v878_v44, %v871_v43  ;;  %v483_v43 = vld [vmem:[%s4361_s5 + $0x90] sm:$0xff] }
 0x1fb   :  { %v2076_v56 = vpack.c.bf16 %v880_v49, %v873_v48  ;;  %v490_v44 = vld [vmem:[%s4361_s5 + $0xc8] sm:$0xff]  ;;  %v2218_v48 = vpack.c.bf16 %v604_v54, %v597_v40  ;;  %v492_v49 = vld [vmem:[%s4361_s5 + $0xd8] sm:$0xff]  ;;  %v539_v54 = vld [vmem:[%s4361_s5 + $0x250] sm:$0xff] }
 0x1fd   :  { %1933 = vmatpush1.bf16.msra.mxu1 %v1932_v57  ;;  %2061 = vmatpush1.bf16.msra.mxu0 %v2060_v62  ;;  %v885_v57 = vld [vmem:[%s4361_s5 + $0xd20] sm:$0xff]  ;;  %v892_v62 = vld [vmem:[%s4361_s5 + $0xd58] sm:$0xff] }
 0x1fe   :  { %1935 = vmatprep.subr.bf16.mxu1 %v1934_v2  ;;  %2063 = vmatprep.subr.bf16.mxu0 %v2062_v4  ;;  %v2078_v2 = vpack.c.bf16 %v895_v53, %v888_v52  ;;  %v887_v4 = vld [vmem:[%s4361_s5 + $0xd30] sm:$0xff]  ;;  %v1952_v10 = vpack.c.bf16 %v892_v62, %v885_v57  ;;  %v618_v53 = vld [vmem:[%s4361_s5 + $0x4c8] sm:$0xff]  ;;  %v2220_v57 = vpack.c.bf16 %v492_v49, %v485_v46  ;;  %v497_v62 = vld [vmem:[%s4361_s5 + $0x100] sm:$0xff] }
 0x1ff   :  { %v611_v52 = vld [vmem:[%s4361_s5 + $0x490] sm:$0xff]  ;;  %v674_v49 = vld [vmem:[%s4361_s5 + $0x688] sm:$0xff] }
 0x200   :  { %v667_v46 = vld [vmem:[%s4361_s5 + $0x650] sm:$0xff] }
 0x201   :  { %1937 = vmatpush1.bf16.msra.mxu1 %v1936_v11  ;;  %2065 = vmatpush1.bf16.msra.mxu0 %v2064_v12  ;;  %v2080_v11 = vpack.c.bf16 %v894_v5, %v887_v4  ;;  %v899_v12 = vld [vmem:[%s4361_s5 + $0xd90] sm:$0xff]  ;;  %v2222_v4 = vpack.c.bf16 %v618_v53, %v611_v52  ;;  %v553_v52 = vld [vmem:[%s4361_s5 + $0x2c0] sm:$0xff]  ;;  %v560_v53 = vld [vmem:[%s4361_s5 + $0x2f8] sm:$0xff] }
 0x202   :  { %1939 = vmatprep.subr.bf16.mxu1 %v1938_v16  ;;  %2067 = vmatprep.subr.bf16.mxu0 %v2066_v17  ;;  %v1954_v16 = vpack.c.bf16 %v907_v7, %v900_v6  ;;  %v2082_v17 = vpack.c.bf16 %v909_v9, %v902_v8  ;;  %v1956_v24 = vpack.c.bf16 %v906_v13, %v899_v12  ;;  %v499_v5 = vld [vmem:[%s4361_s5 + $0x110] sm:$0xff]  ;;  %v506_v6 = vld [vmem:[%s4361_s5 + $0x148] sm:$0xff]  ;;  %v512_v7 = vld [vmem:[%s4361_s5 + $0x178] sm:$0xff] }
 0x203   :  { %v519_v8 = vld [vmem:[%s4361_s5 + $0x1b0] sm:$0xff]  ;;  %v625_v9 = vld [vmem:[%s4361_s5 + $0x500] sm:$0xff]  ;;  %v2224_v12 = vpack.c.bf16 %v506_v6, %v499_v5  ;;  %v688_v6 = vld [vmem:[%s4361_s5 + $0x6f8] sm:$0xff] }
 0x204   :  { %v511_v13 = vld [vmem:[%s4361_s5 + $0x170] sm:$0xff]  ;;  %v681_v5 = vld [vmem:[%s4361_s5 + $0x6c0] sm:$0xff] }
 0x205   :  { %1941 = vmatpush1.bf16.msra.mxu1 %v1940_v26  ;;  %2069 = vmatpush1.bf16.msra.mxu0 %v2068_v28  ;;  %v2084_v26 = vpack.c.bf16 %v908_v19, %v901_v18  ;;  %v447_v28 = vadd.f32 %v3279_v27, %v294_v14  ;;  %v478_v27 = vld [vmem:[%s4361_s5 + $0x68] sm:$0xff]  ;;  %v520_v18 = vld [vmem:[%s4361_s5 + $0x1b8] sm:$0xff] }
 0x206   :  { %1943 = vmatprep.subr.bf16.mxu1 %v1942_v31  ;;  %2071 = vmatprep.subr.bf16.mxu0 %v2070_v32  ;;  %v469_v31 = vld [vmem:[%s4361_s5 + $0x20] sm:$0xff]  ;;  %v476_v32 = vld [vmem:[%s4361_s5 + $0x58] sm:$0xff]  ;;  %v518_v14 = vld [vmem:[%s4361_s5 + $0x1a8] sm:$0xff] }
 0x207   :  { %v3726_v37 = vmax.f32 %v447_v28, 0.0  ;;  %v526_v19 = vld [vmem:[%s4361_s5 + $0x1e8] sm:$0xff]  ;;  %v2100_v23 = vpack.c.bf16 %v518_v14, %v511_v13  ;;  %v532_v28 = vld [vmem:[%s4361_s5 + $0x218] sm:$0xff]  ;;  %v569_v13 = vld [vmem:[%s4361_s5 + $0x340] sm:$0xff] }
 0x208   :  { %v576_v14 = vld [vmem:[%s4361_s5 + $0x378] sm:$0xff] }
 0x209   :  { %1945 = vmatpush1.bf16.msra.mxu1 %v1944_v39  ;;  %2073 = vmatpush1.bf16.msra.mxu0 %v2072_v42  ;;  %v2088_v39 = vpack.c.bf16 %v476_v32, %v469_v31  ;;  %v2216_v42 = vpack.c.bf16 %v478_v27, %v471_v34  ;;  %v527_v31 = vld [vmem:[%s4361_s5 + $0x1f0] sm:$0xff]  ;;  %v534_v32 = vld [vmem:[%s4361_s5 + $0x228] sm:$0xff]  ;;  %v653_v27 = vld [vmem:[%s4361_s5 + $0x5e0] sm:$0xff] }
 0x20a   :  { %1947 = vmatprep.subr.bf16.mxu1 %v1946_v45  ;;  %2075 = vmatprep.subr.bf16.mxu0 %v2074_v3  ;;  %v3735_v45 = vmax.f32 %v455_v33, 0.0  ;;  %v2090_v3 = vpack.c.bf16 %v491_v36, %v484_v35  ;;  %v540_v33 = vld [vmem:[%s4361_s5 + $0x258] sm:$0xff]  ;;  %v547_v34 = vld [vmem:[%s4361_s5 + $0x290] sm:$0xff]  ;;  %v2232_v40 = vpack.c.bf16 %v534_v32, %v527_v31  ;;  %v821_v31 = vld [vmem:[%s4361_s5 + $0xb20] sm:$0xff] }
 0x20b   :  { %v660_v35 = vld [vmem:[%s4361_s5 + $0x618] sm:$0xff] }
 0x20c   :  { %v828_v32 = vld [vmem:[%s4361_s5 + $0xb58] sm:$0xff] }
 0x20d   :  { %1949 = vmatpush1.bf16.msra.mxu1 %v1948_v55  ;;  %2077 = vmatpush1.bf16.msra.mxu0 %v2076_v56  ;;  %v3759_v55 = vmax.f32 %v453_v38, 0.0  ;;  %v2092_v56 = vpack.c.bf16 %v490_v44, %v483_v43  ;;  %v546_v38 = vld [vmem:[%s4361_s5 + $0x288] sm:$0xff]  ;;  %v541_v43 = vld [vmem:[%s4361_s5 + $0x260] sm:$0xff]  ;;  %v548_v44 = vld [vmem:[%s4361_s5 + $0x298] sm:$0xff] }
 0x20e   :  { %1951 = vmatprep.subr.bf16.mxu1 %v1950_v0  ;;  %2079 = vmatprep.subr.bf16.mxu0 %v2078_v2  ;;  %v504_v0 = vld [vmem:[%s4361_s5 + $0x138] sm:$0xff]  ;;  %v2094_v2 = vpack.c.bf16 %v505_v51, %v498_v50  ;;  %v2108_v50 = vpack.c.bf16 %v546_v38, %v539_v54  ;;  %v2236_v51 = vpack.c.bf16 %v548_v44, %v541_v43  ;;  %v835_v43 = vld [vmem:[%s4361_s5 + $0xb90] sm:$0xff]  ;;  %v842_v44 = vld [vmem:[%s4361_s5 + $0xbc8] sm:$0xff] }
 0x20f   :  { %v2250_v54 = vpack.c.bf16 %v828_v32, %v821_v31  ;;  %v716_v38 = vld [vmem:[%s4361_s5 + $0x7d8] sm:$0xff]  ;;  %v651_v32 = vld [vmem:[%s4361_s5 + $0x5d0] sm:$0xff] }
 0x211   :  { %1953 = vmatpush1.bf16.msra.mxu1 %v1952_v10  ;;  %2081 = vmatpush1.bf16.msra.mxu0 %v2080_v11  ;;  %v632_v10 = vld [vmem:[%s4361_s5 + $0x538] sm:$0xff]  ;;  %v2096_v11 = vpack.c.bf16 %v504_v0, %v497_v62  ;;  %v555_v62 = vld [vmem:[%s4361_s5 + $0x2d0] sm:$0xff]  ;;  %v562_v0 = vld [vmem:[%s4361_s5 + $0x308] sm:$0xff] }
 0x212   :  { %1955 = vmatprep.subr.bf16.mxu1 %v1954_v16  ;;  %2083 = vmatprep.subr.bf16.mxu0 %v2082_v17  ;;  %v2098_v16 = vpack.c.bf16 %v519_v8, %v512_v7  ;;  %v2226_v17 = vpack.c.bf16 %v632_v10, %v625_v9  ;;  %v2112_v7 = vpack.c.bf16 %v560_v53, %v553_v52  ;;  %v567_v9 = vld [vmem:[%s4361_s5 + $0x330] sm:$0xff]  ;;  %v574_v10 = vld [vmem:[%s4361_s5 + $0x368] sm:$0xff] }
 0x213   :  { %v2240_v8 = vpack.c.bf16 %v562_v0, %v555_v62  ;;  %v2254_v52 = vpack.c.bf16 %v842_v44, %v835_v43  ;;  %v730_v53 = vld [vmem:[%s4361_s5 + $0x848] sm:$0xff]  ;;  %v849_v62 = vld [vmem:[%s4361_s5 + $0xc00] sm:$0xff]  ;;  %v856_v0 = vld [vmem:[%s4361_s5 + $0xc38] sm:$0xff] }
 0x214   :  { %v665_v44 = vld [vmem:[%s4361_s5 + $0x640] sm:$0xff] }
 0x215   :  { %1957 = vmatpush1.bf16.msra.mxu1 %v1956_v24  ;;  %2085 = vmatpush1.bf16.msra.mxu0 %v2084_v26  ;;  %v525_v26 = vld [vmem:[%s4361_s5 + $0x1e0] sm:$0xff] }
 0x216   :  { %2087 = vmatprep.subr.bf16.mxu1 %v2086_v29  ;;  %2215 = vmatprep.subr.bf16.mxu0 %v2214_v30  ;;  %v2102_v29 = vpack.c.bf16 %v533_v20, %v526_v19  ;;  %v2230_v30 = vpack.c.bf16 %v646_v21, %v639_v22  ;;  %v2104_v36 = vpack.c.bf16 %v532_v28, %v525_v26  ;;  %v695_v26 = vld [vmem:[%s4361_s5 + $0x730] sm:$0xff]  ;;  %v702_v28 = vld [vmem:[%s4361_s5 + $0x768] sm:$0xff] }
 0x217   :  { %v2116_v19 = vpack.c.bf16 %v574_v10, %v567_v9  ;;  %v2244_v20 = vpack.c.bf16 %v576_v14, %v569_v13  ;;  %v2258_v9 = vpack.c.bf16 %v856_v0, %v849_v62  ;;  %v744_v10 = vld [vmem:[%s4361_s5 + $0x8b8] sm:$0xff]  ;;  %v863_v13 = vld [vmem:[%s4361_s5 + $0xc70] sm:$0xff]  ;;  %v870_v14 = vld [vmem:[%s4361_s5 + $0xca8] sm:$0xff] }
 0x218   :  { %1092 = vmatmul.mubr.f32.vlgmr.msra.gmra.mrb[4].mxu1 %v3726_v37  ;;  %1246 = vmatmul.mubr.f32.vlgmr.msra.gmra.mrb[8].mxu0 %v3726_v37  ;;  %v679_v0 = vld [vmem:[%s4361_s5 + $0x6b0] sm:$0xff] }
 0x219   :  { %1097 = vmatprep.mubr.f32.mxu1 %v3735_v45  ;;  %1251 = vmatprep.mubr.f32.mxu0 %v3735_v45 }
 0x21a   :  { %2089 = vmatpush1.bf16.msra.mxu1 %v2088_v39  ;;  %2217 = vmatpush3.bf16.msra.mxu0 %v2216_v42  ;;  %v2106_v39 = vpack.c.bf16 %v547_v34, %v540_v33  ;;  %v2234_v42 = vpack.c.bf16 %v660_v35, %v653_v27  ;;  %v2248_v34 = vpack.c.bf16 %v702_v28, %v695_v26  ;;  %v595_v35 = vld [vmem:[%s4361_s5 + $0x410] sm:$0xff]  ;;  %v877_v26 = vld [vmem:[%s4361_s5 + $0xce0] sm:$0xff]  ;;  %v884_v28 = vld [vmem:[%s4361_s5 + $0xd18] sm:$0xff] }
 0x21b   :  { %2091 = vmatprep.subr.bf16.mxu1 %v2090_v3  ;;  %2219 = vmatprep.subr.bf16.mxu0 %v2218_v48  ;;  %v554_v3 = vld [vmem:[%s4361_s5 + $0x2c8] sm:$0xff]  ;;  %v561_v48 = vld [vmem:[%s4361_s5 + $0x300] sm:$0xff] }
 0x21c   :  { %1098 = vmatmul.mubr.f32.gmra.mrb[6].mxu1 %v3759_v55  ;;  %1252 = vmatmul.mubr.f32.gmra.mrb[10].mxu0 %v3759_v55 }
 0x21d   :  { %1322 = vmatprep.mubr.f32.mxu1 %v3310_v41  ;;  %1476 = vmatprep.mubr.f32.mxu0 %v3310_v41  ;;  %v513_v41 = vld [vmem:[%s4361_s5 + $0x180] sm:$0xff] }
 0x21e   :  { %2093 = vmatpush1.bf16.msra.mxu1 %v2092_v56  ;;  %2221 = vmatpush3.bf16.msra.mxu0 %v2220_v57  ;;  %v2228_v24 = vpack.c.bf16 %v520_v18, %v513_v41  ;;  %v2110_v56 = vpack.c.bf16 %v561_v48, %v554_v3  ;;  %v2238_v57 = vpack.c.bf16 %v674_v49, %v667_v46  ;;  %v807_v41 = vld [vmem:[%s4361_s5 + $0xab0] sm:$0xff]  ;;  %v814_v18 = vld [vmem:[%s4361_s5 + $0xae8] sm:$0xff]  ;;  %v609_v49 = vld [vmem:[%s4361_s5 + $0x480] sm:$0xff] }
 0x21f   :  { %2095 = vmatprep.subr.bf16.mxu1 %v2094_v2  ;;  %2223 = vmatprep.subr.bf16.mxu0 %v2222_v4  ;;  %v568_v2 = vld [vmem:[%s4361_s5 + $0x338] sm:$0xff]  ;;  %v575_v4 = vld [vmem:[%s4361_s5 + $0x370] sm:$0xff]  ;;  %v2246_v21 = vpack.c.bf16 %v814_v18, %v807_v41  ;;  %v637_v18 = vld [vmem:[%s4361_s5 + $0x560] sm:$0xff] }
 0x222   :  { %2097 = vmatpush1.bf16.msra.mxu1 %v2096_v11  ;;  %2225 = vmatpush3.bf16.msra.mxu0 %v2224_v12  ;;  %v2114_v11 = vpack.c.bf16 %v575_v4, %v568_v2  ;;  %v2242_v12 = vpack.c.bf16 %v688_v6, %v681_v5  ;;  %v623_v6 = vld [vmem:[%s4361_s5 + $0x4f0] sm:$0xff] }
 0x223   :  { %2099 = vmatprep.subr.bf16.mxu1 %v2098_v16  ;;  %2227 = vmatprep.subr.bf16.mxu0 %v2226_v17  ;;  %v582_v16 = vld [vmem:[%s4361_s5 + $0x3a8] sm:$0xff]  ;;  %v589_v17 = vld [vmem:[%s4361_s5 + $0x3e0] sm:$0xff] }
 0x224   :  { %v2118_v22 = vpack.c.bf16 %v589_v17, %v582_v16 }
 0x226   :  { %2101 = vmatpush1.bf16.msra.mxu1 %v2100_v23  ;;  %2229 = vmatpush3.bf16.msra.mxu0 %v2228_v24  ;;  %v581_v23 = vld [vmem:[%s4361_s5 + $0x3a0] sm:$0xff]  ;;  %v588_v24 = vld [vmem:[%s4361_s5 + $0x3d8] sm:$0xff] }
 0x227   :  { %2103 = vmatprep.subr.bf16.mxu1 %v2102_v29  ;;  %2231 = vmatprep.subr.bf16.mxu0 %v2230_v30  ;;  %v596_v29 = vld [vmem:[%s4361_s5 + $0x418] sm:$0xff]  ;;  %v603_v30 = vld [vmem:[%s4361_s5 + $0x450] sm:$0xff]  ;;  %v2120_v33 = vpack.c.bf16 %v588_v24, %v581_v23 }
 0x228   :  { %v2122_v27 = vpack.c.bf16 %v603_v30, %v596_v29  ;;  %v652_v23 = vld [vmem:[%s4361_s5 + $0x5d8] sm:$0xff]  ;;  %v659_v24 = vld [vmem:[%s4361_s5 + $0x610] sm:$0xff] }
 0x229   :  { %v2138_v31 = vpack.c.bf16 %v659_v24, %v652_v23  ;;  %v728_v24 = vld [vmem:[%s4361_s5 + $0x838] sm:$0xff] }
 0x22a   :  { %2105 = vmatpush1.bf16.msra.mxu1 %v2104_v36  ;;  %2233 = vmatpush3.bf16.msra.mxu0 %v2232_v40  ;;  %v602_v36 = vld [vmem:[%s4361_s5 + $0x448] sm:$0xff]  ;;  %v709_v40 = vld [vmem:[%s4361_s5 + $0x7a0] sm:$0xff] }
 0x22b   :  { %2107 = vmatprep.subr.bf16.mxu1 %v2106_v39  ;;  %2235 = vmatprep.subr.bf16.mxu0 %v2234_v42  ;;  %v610_v39 = vld [vmem:[%s4361_s5 + $0x488] sm:$0xff]  ;;  %v617_v42 = vld [vmem:[%s4361_s5 + $0x4c0] sm:$0xff]  ;;  %v2124_v3 = vpack.c.bf16 %v602_v36, %v595_v35  ;;  %v2252_v48 = vpack.c.bf16 %v716_v38, %v709_v40  ;;  %v772_v35 = vld [vmem:[%s4361_s5 + $0x998] sm:$0xff] }
 0x22c   :  { %v2126_v46 = vpack.c.bf16 %v617_v42, %v610_v39  ;;  %v666_v36 = vld [vmem:[%s4361_s5 + $0x648] sm:$0xff]  ;;  %v673_v40 = vld [vmem:[%s4361_s5 + $0x680] sm:$0xff] }
 0x22d   :  { %v898_v38 = vld [vmem:[%s4361_s5 + $0xd88] sm:$0xff]  ;;  %v2142_v43 = vpack.c.bf16 %v673_v40, %v666_v36  ;;  %v771_v36 = vld [vmem:[%s4361_s5 + $0x990] sm:$0xff] }
 0x22e   :  { %2109 = vmatpush1.bf16.msra.mxu1 %v2108_v50  ;;  %2237 = vmatpush3.bf16.msra.mxu0 %v2236_v51  ;;  %v616_v50 = vld [vmem:[%s4361_s5 + $0x4b8] sm:$0xff]  ;;  %v723_v51 = vld [vmem:[%s4361_s5 + $0x810] sm:$0xff] }
 0x22f   :  { %2111 = vmatprep.subr.bf16.mxu1 %v2110_v56  ;;  %2239 = vmatprep.subr.bf16.mxu0 %v2238_v57  ;;  %v624_v56 = vld [vmem:[%s4361_s5 + $0x4f8] sm:$0xff]  ;;  %v631_v57 = vld [vmem:[%s4361_s5 + $0x530] sm:$0xff]  ;;  %v2128_v2 = vpack.c.bf16 %v616_v50, %v609_v49  ;;  %v2256_v4 = vpack.c.bf16 %v730_v53, %v723_v51  ;;  %v786_v49 = vld [vmem:[%s4361_s5 + $0xa08] sm:$0xff] }
 0x230   :  { %v2130_v5 = vpack.c.bf16 %v631_v57, %v624_v56  ;;  %v680_v50 = vld [vmem:[%s4361_s5 + $0x6b8] sm:$0xff]  ;;  %v687_v51 = vld [vmem:[%s4361_s5 + $0x6f0] sm:$0xff] }
 0x231   :  { %v912_v53 = vld [vmem:[%s4361_s5 + $0xdf8] sm:$0xff]  ;;  %v2146_v62 = vpack.c.bf16 %v687_v51, %v680_v50  ;;  %v799_v50 = vld [vmem:[%s4361_s5 + $0xa70] sm:$0xff] }
 0x232   :  { %2113 = vmatpush1.bf16.msra.mxu1 %v2112_v7  ;;  %2241 = vmatpush3.bf16.msra.mxu0 %v2240_v8  ;;  %v630_v7 = vld [vmem:[%s4361_s5 + $0x528] sm:$0xff]  ;;  %v737_v8 = vld [vmem:[%s4361_s5 + $0x880] sm:$0xff] }
 0x233   :  { %2115 = vmatprep.subr.bf16.mxu1 %v2114_v11  ;;  %2243 = vmatprep.subr.bf16.mxu0 %v2242_v12  ;;  %v638_v11 = vld [vmem:[%s4361_s5 + $0x568] sm:$0xff]  ;;  %v645_v12 = vld [vmem:[%s4361_s5 + $0x5a0] sm:$0xff]  ;;  %v2132_v16 = vpack.c.bf16 %v630_v7, %v623_v6  ;;  %v2260_v17 = vpack.c.bf16 %v744_v10, %v737_v8  ;;  %v800_v6 = vld [vmem:[%s4361_s5 + $0xa78] sm:$0xff] }
 0x234   :  { %v2134_v41 = vpack.c.bf16 %v645_v12, %v638_v11  ;;  %v694_v7 = vld [vmem:[%s4361_s5 + $0x728] sm:$0xff]  ;;  %v701_v8 = vld [vmem:[%s4361_s5 + $0x760] sm:$0xff] }
 0x235   :  { %v2150_v11 = vpack.c.bf16 %v701_v8, %v694_v7  ;;  %v693_v12 = vld [vmem:[%s4361_s5 + $0x720] sm:$0xff]  ;;  %v827_v7 = vld [vmem:[%s4361_s5 + $0xb50] sm:$0xff] }
 0x236   :  { %2117 = vmatpush1.bf16.msra.mxu1 %v2116_v19  ;;  %2245 = vmatpush3.bf16.msra.mxu0 %v2244_v20  ;;  %v644_v19 = vld [vmem:[%s4361_s5 + $0x598] sm:$0xff]  ;;  %v751_v20 = vld [vmem:[%s4361_s5 + $0x8f0] sm:$0xff] }
 0x237   :  { %2119 = vmatprep.subr.bf16.mxu1 %v2118_v22  ;;  %2247 = vmatprep.subr.bf16.mxu0 %v2246_v21  ;;  %v2262_v22 = vpack.c.bf16 %v870_v14, %v863_v13  ;;  %v758_v21 = vld [vmem:[%s4361_s5 + $0x928] sm:$0xff]  ;;  %v2136_v29 = vpack.c.bf16 %v644_v19, %v637_v18  ;;  %v700_v13 = vld [vmem:[%s4361_s5 + $0x758] sm:$0xff]  ;;  %v707_v18 = vld [vmem:[%s4361_s5 + $0x790] sm:$0xff] }
 0x238   :  { %v2264_v30 = vpack.c.bf16 %v758_v21, %v751_v20  ;;  %v708_v14 = vld [vmem:[%s4361_s5 + $0x798] sm:$0xff]  ;;  %v714_v19 = vld [vmem:[%s4361_s5 + $0x7c8] sm:$0xff] }
 0x239   :  { %1477 = vmatmul.mubr.f32.vlgmr.msra.gmra.mrb[12].mxu0 %v3317_v47  ;;  %v722_v20 = vld [vmem:[%s4361_s5 + $0x808] sm:$0xff]  ;;  %v2156_v21 = vpack.c.bf16 %v714_v19, %v707_v18  ;;  %v848_v18 = vld [vmem:[%s4361_s5 + $0xbf8] sm:$0xff]  ;;  %v855_v19 = vld [vmem:[%s4361_s5 + $0xc30] sm:$0xff] }
 0x23a   :  { %2121 = vmatpush1.bf16.msra.mxu1 %v2120_v33  ;;  %1481 = vmatprep.mubr.f32.mxu0 %v3349_v1  ;;  %v658_v33 = vld [vmem:[%s4361_s5 + $0x608] sm:$0xff] }
 0x23b   :  { %2249 = vmatpush3.bf16.msra.mxu0 %v2248_v34  ;;  %2123 = vmatprep.subr.bf16.mxu1 %v2122_v27  ;;  %v765_v34 = vld [vmem:[%s4361_s5 + $0x960] sm:$0xff]  ;;  %v2266_v27 = vpack.c.bf16 %v884_v28, %v877_v26  ;;  %v2140_v39 = vpack.c.bf16 %v658_v33, %v651_v32  ;;  %v743_v26 = vld [vmem:[%s4361_s5 + $0x8b0] sm:$0xff] }
 0x23c   :  { %2251 = vmatprep.subr.bf16.mxu0 %v2250_v54  ;;  %v891_v54 = vld [vmem:[%s4361_s5 + $0xd50] sm:$0xff]  ;;  %v2268_v42 = vpack.c.bf16 %v772_v35, %v765_v34  ;;  %v749_v34 = vld [vmem:[%s4361_s5 + $0x8e0] sm:$0xff]  ;;  %v764_v35 = vld [vmem:[%s4361_s5 + $0x958] sm:$0xff] }
 0x23d   :  { %1482 = vmatmul.mubr.f32.gmra.mrb[14].mxu0 %v3336_v60 }
 0x23e   :  { %2125 = vmatpush1.bf16.msra.mxu1 %v2124_v3  ;;  %1551 = vmatprep.mubr.f32.mxu0 %v3377_v15  ;;  %v672_v3 = vld [vmem:[%s4361_s5 + $0x678] sm:$0xff] }
 0x23f   :  { %2253 = vmatpush3.bf16.msra.mxu0 %v2252_v48  ;;  %2127 = vmatprep.subr.bf16.mxu1 %v2126_v46  ;;  %v779_v48 = vld [vmem:[%s4361_s5 + $0x9d0] sm:$0xff]  ;;  %v2270_v46 = vpack.c.bf16 %v898_v38, %v891_v54  ;;  %v2144_v56 = vpack.c.bf16 %v672_v3, %v665_v44  ;;  %v2170_v54 = vpack.c.bf16 %v771_v36, %v764_v35 }
 0x240   :  { %2255 = vmatprep.subr.bf16.mxu0 %v2254_v52  ;;  %v905_v52 = vld [vmem:[%s4361_s5 + $0xdc0] sm:$0xff]  ;;  %v2272_v57 = vpack.c.bf16 %v786_v49, %v779_v48  ;;  %v763_v38 = vld [vmem:[%s4361_s5 + $0x950] sm:$0xff]  ;;  %v792_v49 = vld [vmem:[%s4361_s5 + $0xa38] sm:$0xff] }
 0x241   :  { %v777_v48 = vld [vmem:[%s4361_s5 + $0x9c0] sm:$0xff] }
 0x242   :  { %2129 = vmatpush1.bf16.msra.mxu1 %v2128_v2  ;;  %v686_v2 = vld [vmem:[%s4361_s5 + $0x6e8] sm:$0xff] }
 0x243   :  { %2257 = vmatpush3.bf16.msra.mxu0 %v2256_v4  ;;  %2131 = vmatprep.subr.bf16.mxu1 %v2130_v5  ;;  %v793_v4 = vld [vmem:[%s4361_s5 + $0xa40] sm:$0xff]  ;;  %v2274_v5 = vpack.c.bf16 %v912_v53, %v905_v52  ;;  %v2178_v52 = vpack.c.bf16 %v799_v50, %v792_v49  ;;  %v791_v53 = vld [vmem:[%s4361_s5 + $0xa30] sm:$0xff] }
 0x244   :  { %2259 = vmatprep.subr.bf16.mxu0 %v2258_v9  ;;  %v2148_v9 = vpack.c.bf16 %v686_v2, %v679_v0  ;;  %v2276_v10 = vpack.c.bf16 %v800_v6, %v793_v4  ;;  %v805_v4 = vld [vmem:[%s4361_s5 + $0xaa0] sm:$0xff]  ;;  %v820_v6 = vld [vmem:[%s4361_s5 + $0xb18] sm:$0xff] }
 0x246   :  { %2133 = vmatpush1.bf16.msra.mxu1 %v2132_v16  ;;  %v715_v16 = vld [vmem:[%s4361_s5 + $0x7d0] sm:$0xff] }
 0x247   :  { %2261 = vmatpush3.bf16.msra.mxu0 %v2260_v17  ;;  %2135 = vmatprep.subr.bf16.mxu1 %v2134_v41  ;;  %v2152_v17 = vpack.c.bf16 %v700_v13, %v693_v12  ;;  %v2154_v41 = vpack.c.bf16 %v715_v16, %v708_v14  ;;  %v834_v12 = vld [vmem:[%s4361_s5 + $0xb88] sm:$0xff]  ;;  %v841_v13 = vld [vmem:[%s4361_s5 + $0xbc0] sm:$0xff] }
 0x248   :  { %2263 = vmatprep.subr.bf16.mxu0 %v2262_v22  ;;  %v729_v22 = vld [vmem:[%s4361_s5 + $0x840] sm:$0xff]  ;;  %v2190_v16 = vpack.c.bf16 %v841_v13, %v834_v12 }
 0x249   :  { %v2158_v23 = vpack.c.bf16 %v729_v22, %v722_v20  ;;  %v2194_v22 = vpack.c.bf16 %v855_v19, %v848_v18 }
 0x24a   :  { %2137 = vmatpush1.bf16.msra.mxu1 %v2136_v29 }
 0x24b   :  { %2265 = vmatpush3.bf16.msra.mxu0 %v2264_v30  ;;  %2139 = vmatprep.subr.bf16.mxu1 %v2138_v31  ;;  %v742_v30 = vld [vmem:[%s4361_s5 + $0x8a8] sm:$0xff] }
 0x24c   :  { %2267 = vmatprep.subr.bf16.mxu0 %v2266_v27  ;;  %v750_v31 = vld [vmem:[%s4361_s5 + $0x8e8] sm:$0xff]  ;;  %v756_v27 = vld [vmem:[%s4361_s5 + $0x918] sm:$0xff] }
 0x24d   :  { %v2168_v40 = vpack.c.bf16 %v756_v27, %v749_v34  ;;  %v890_v34 = vld [vmem:[%s4361_s5 + $0xd48] sm:$0xff]  ;;  %v897_v27 = vld [vmem:[%s4361_s5 + $0xd80] sm:$0xff] }
 0x24e   :  { %2141 = vmatpush1.bf16.msra.mxu1 %v2140_v39  ;;  %v770_v39 = vld [vmem:[%s4361_s5 + $0x988] sm:$0xff]  ;;  %v2206_v36 = vpack.c.bf16 %v897_v27, %v890_v34  ;;  %v937_v34 = vsub.s32 5, %v2872_v58 }
 0x24f   :  { %2269 = vmatpush3.bf16.msra.mxu0 %v2268_v42  ;;  %2143 = vmatprep.subr.bf16.mxu1 %v2142_v43  ;;  %v778_v42 = vld [vmem:[%s4361_s5 + $0x9c8] sm:$0xff]  ;;  %v785_v43 = vld [vmem:[%s4361_s5 + $0xa00] sm:$0xff]  ;;  %v2172_v44 = vpack.c.bf16 %v770_v39, %v763_v38  ;;  %v904_v38 = vld [vmem:[%s4361_s5 + $0xdb8] sm:$0xff] }
 0x250   :  { %2271 = vmatprep.subr.bf16.mxu0 %v2270_v46  ;;  %v2174_v3 = vpack.c.bf16 %v785_v43, %v778_v42  ;;  %v784_v46 = vld [vmem:[%s4361_s5 + $0x9f8] sm:$0xff]  ;;  %v911_v39 = vld [vmem:[%s4361_s5 + $0xdf0] sm:$0xff] }
 0x251   :  { %v2176_v51 = vpack.c.bf16 %v784_v46, %v777_v48  ;;  %v2210_v43 = vpack.c.bf16 %v911_v39, %v904_v38  ;;  %v4298_v46 = vld [vmem:[%s4364_s6] sm:$0xff] }
 0x252   :  { %2145 = vmatpush1.bf16.msra.mxu1 %v2144_v56  ;;  %v798_v56 = vld [vmem:[%s4361_s5 + $0xa68] sm:$0xff]  ;;  %v918_v49 = vrot.slane %v4298_v46, %v2875_v59  ;;  %v926_v50 = vrot.slane %v4298_v46, %v293_v63 }
 0x253   :  { %2273 = vmatpush3.bf16.msra.mxu0 %v2272_v57  ;;  %2147 = vmatprep.subr.bf16.mxu1 %v2146_v62  ;;  %v806_v57 = vld [vmem:[%s4361_s5 + $0xaa8] sm:$0xff]  ;;  %v813_v62 = vld [vmem:[%s4361_s5 + $0xae0] sm:$0xff]  ;;  %v2180_v0 = vpack.c.bf16 %v798_v56, %v791_v53 }
 0x254   :  { %2275 = vmatprep.subr.bf16.mxu0 %v2274_v5  ;;  %v2182_v2 = vpack.c.bf16 %v813_v62, %v806_v57  ;;  %v812_v5 = vld [vmem:[%s4361_s5 + $0xad8] sm:$0xff] }
 0x255   :  { %v2184_v8 = vpack.c.bf16 %v812_v5, %v805_v4 }
 0x256   :  { %2149 = vmatpush1.bf16.msra.mxu1 %v2148_v9  ;;  %v2186_v9 = vpack.c.bf16 %v827_v7, %v820_v6 }
 0x257   :  { %2277 = vmatpush3.bf16.msra.mxu0 %v2276_v10  ;;  %2151 = vmatprep.subr.bf16.mxu1 %v2150_v11  ;;  %v819_v10 = vld [vmem:[%s4361_s5 + $0xb10] sm:$0xff]  ;;  %v826_v11 = vld [vmem:[%s4361_s5 + $0xb48] sm:$0xff] }
 0x258   :  { %v2188_v14 = vpack.c.bf16 %v826_v11, %v819_v10 }
 0x259   :  { %1323 = vmatmul.mubr.f32.vlgmr.msra.gmra.mrb[8].mxu1 %v3317_v47  ;;  %v721_v47 = vld [vmem:[%s4361_s5 + $0x800] sm:$0xff] }
 0x25a   :  { %1552 = vmatmul.mubr.f32.vlgmr.msra.gmra.mrb[16].mxu0 %v3726_v37  ;;  %1328 = vmatprep.mubr.f32.mxu1 %v3349_v1  ;;  %v736_v1 = vld [vmem:[%s4361_s5 + $0x878] sm:$0xff]  ;;  %v2160_v28 = vpack.c.bf16 %v728_v24, %v721_v47  ;;  %v862_v47 = vld [vmem:[%s4361_s5 + $0xc68] sm:$0xff]  ;;  %v869_v24 = vld [vmem:[%s4361_s5 + $0xca0] sm:$0xff] }
 0x25b   :  { %2153 = vmatpush1.bf16.msra.mxu1 %v2152_v17  ;;  %1556 = vmatprep.mubr.f32.mxu0 %v3735_v45  ;;  %v2162_v29 = vpack.c.bf16 %v743_v26, %v736_v1  ;;  %v833_v17 = vld [vmem:[%s4361_s5 + $0xb80] sm:$0xff]  ;;  %v2198_v26 = vpack.c.bf16 %v869_v24, %v862_v47 }
 0x25c   :  { %2155 = vmatprep.subr.bf16.mxu1 %v2154_v41  ;;  %v840_v41 = vld [vmem:[%s4361_s5 + $0xbb8] sm:$0xff] }
 0x25d   :  { %1329 = vmatmul.mubr.f32.gmra.mrb[10].mxu1 %v3336_v60  ;;  %v735_v60 = vld [vmem:[%s4361_s5 + $0x870] sm:$0xff]  ;;  %v2192_v20 = vpack.c.bf16 %v840_v41, %v833_v17 }
 0x25e   :  { %1557 = vmatmul.mubr.f32.gmra.mrb[18].mxu0 %v3759_v55  ;;  %1399 = vmatprep.mubr.f32.mxu1 %v3377_v15  ;;  %v757_v15 = vld [vmem:[%s4361_s5 + $0x920] sm:$0xff]  ;;  %v2164_v32 = vpack.c.bf16 %v742_v30, %v735_v60  ;;  %v876_v60 = vld [vmem:[%s4361_s5 + $0xcd8] sm:$0xff]  ;;  %v883_v30 = vld [vmem:[%s4361_s5 + $0xd10] sm:$0xff] }
 0x25f   :  { %2157 = vmatpush1.bf16.msra.mxu1 %v2156_v21  ;;  %v2166_v33 = vpack.c.bf16 %v757_v15, %v750_v31  ;;  %v847_v21 = vld [vmem:[%s4361_s5 + $0xbf0] sm:$0xff]  ;;  %v2202_v15 = vpack.c.bf16 %v883_v30, %v876_v60 }
 0x260   :  { %2159 = vmatprep.subr.bf16.mxu1 %v2158_v23  ;;  %v854_v23 = vld [vmem:[%s4361_s5 + $0xc28] sm:$0xff] }
 0x261   :  { %v2196_v1 = vpack.c.bf16 %v854_v23, %v847_v21 }
 0x263   :  { %2161 = vmatpush1.bf16.msra.mxu1 %v2160_v28  ;;  %v861_v28 = vld [vmem:[%s4361_s5 + $0xc60] sm:$0xff] }
 0x264   :  { %2163 = vmatprep.subr.bf16.mxu1 %v2162_v29  ;;  %v868_v29 = vld [vmem:[%s4361_s5 + $0xc98] sm:$0xff] }
 0x265   :  { %v2200_v31 = vpack.c.bf16 %v868_v29, %v861_v28 }
 0x267   :  { %2165 = vmatpush1.bf16.msra.mxu1 %v2164_v32  ;;  %v875_v32 = vld [vmem:[%s4361_s5 + $0xcd0] sm:$0xff] }
 0x268   :  { %2167 = vmatprep.subr.bf16.mxu1 %v2166_v33  ;;  %v882_v33 = vld [vmem:[%s4361_s5 + $0xd08] sm:$0xff] }
 0x269   :  { %v2204_v35 = vpack.c.bf16 %v882_v33, %v875_v32  ;;  %v933_v33 = vsub.s32 4, %v2872_v58 }
 0x26b   :  { %2169 = vmatpush1.bf16.msra.mxu1 %v2168_v40  ;;  %v889_v40 = vld [vmem:[%s4361_s5 + $0xd40] sm:$0xff]  ;;  %v934_v27 = vrot.slane %v4298_v46, %v933_v33 }
 0x26c   :  { %2171 = vmatprep.subr.bf16.mxu1 %v2170_v54  ;;  %v896_v54 = vld [vmem:[%s4361_s5 + $0xd78] sm:$0xff] }
 0x26d   :  { %v2208_v42 = vpack.c.bf16 %v896_v54, %v889_v40 }
 0x26f   :  { %2173 = vmatpush1.bf16.msra.mxu1 %v2172_v44  ;;  %v903_v44 = vld [vmem:[%s4361_s5 + $0xdb0] sm:$0xff] }
 0x270   :  { %2175 = vmatprep.subr.bf16.mxu1 %v2174_v3  ;;  %v910_v3 = vld [vmem:[%s4361_s5 + $0xde8] sm:$0xff] }
 0x271   :  { %v2212_v48 = vpack.c.bf16 %v910_v3, %v903_v44 }
 0x273   :  { %2177 = vmatpush1.bf16.msra.mxu1 %v2176_v51  ;;  %v922_v51 = vrot.slane %v4298_v46, %v2881_v61 }
 0x274   :  { %2179 = vmatprep.subr.bf16.mxu1 %v2178_v52 }
 0x277   :  { %2181 = vmatpush1.bf16.msra.mxu1 %v2180_v0 }
 0x278   :  { %2183 = vmatprep.subr.bf16.mxu1 %v2182_v2 }
 0x27b   :  { %2185 = vmatpush1.bf16.msra.mxu1 %v2184_v8 }
 0x27c   :  { %2187 = vmatprep.subr.bf16.mxu1 %v2186_v9 }
 0x27f   :  { %2189 = vmatpush1.bf16.msra.mxu1 %v2188_v14 }
 0x280   :  { %2191 = vmatprep.subr.bf16.mxu1 %v2190_v16 }
 0x283   :  { %2193 = vmatpush1.bf16.msra.mxu1 %v2192_v20 }
 0x284   :  { %2195 = vmatprep.subr.bf16.mxu1 %v2194_v22  ;;  %v941_v22 = vsub.s32 6, %v2872_v58 }
 0x286   :  { %v942_v21 = vrot.slane %v4298_v46, %v941_v22 }
 0x287   :  { %2197 = vmatpush1.bf16.msra.mxu1 %v2196_v1 }
 0x288   :  { %2199 = vmatprep.subr.bf16.mxu1 %v2198_v26 }
 0x28b   :  { %2201 = vmatpush1.bf16.msra.mxu1 %v2200_v31 }
 0x28c   :  { %2203 = vmatprep.subr.bf16.mxu1 %v2202_v15 }
 0x28f   :  { %2205 = vmatpush1.bf16.msra.mxu1 %v2204_v35  ;;  %v938_v35 = vrot.slane %v4298_v46, %v937_v34 }
 0x290   :  { %2207 = vmatprep.subr.bf16.mxu1 %v2206_v36 }
 0x293   :  { %2209 = vmatpush1.bf16.msra.mxu1 %v2208_v42 }
 0x294   :  { %2211 = vmatprep.subr.bf16.mxu1 %v2210_v43 }
 0x297   :  { %2213 = vmatpush1.bf16.msra.mxu1 %v2212_v48 }
 0x29a   :  { %1400 = vmatmul.mubr.f32.vlgmr.msra.gmra.mrb[8].mxu1 %v3726_v37  ;;  %v930_v37 = vrot.slane %v4298_v46, %v297_v25 }
 0x29b   :  { %1405 = vmatprep.mubr.f32.mxu1 %v3735_v45 }
 0x29e   :  { %1406 = vmatmul.mubr.f32.gmra.mrb[10].mxu1 %v3759_v55 }
 0x2eb   :  { %v1093_v45 = vpop.f32.mrb[4].mxu1  ;;  %v1247_v55 = vpop.f32.mrb[8].mxu0 }
 0x2ec   :  { %v2278_v52 = vadd.f32 %v1093_v45, %v918_v49  ;;  %v2282_v53 = vadd.f32 %v1247_v55, %v926_v50  ;;  %v1095_v56 = vpop.f32.mrb[5].mxu1  ;;  %v1249_v57 = vpop.f32.mrb[9].mxu0 }
 0x2ed   :  { %v2279_v62 = vadd.f32 %v1095_v56, %v922_v51  ;;  %v2283_v0 = vadd.f32 %v1249_v57, %v930_v37 }
 0x2ee   :  { %2303 = vtanh.f32 %v2278_v52 }
 0x2ef   :  { %2305 = vtanh.f32 %v2282_v53  ;;  %v1099_v59 = vpop.f32.mrb[6].mxu1  ;;  %v1253_v2 = vpop.f32.mrb[10].mxu0 }
 0x2f0   :  { %2307 = vtanh.f32 %v2279_v62  ;;  %v2280_v63 = vadd.f32 %v1099_v59, %v918_v49  ;;  %v2284_v4 = vadd.f32 %v1253_v2, %v926_v50  ;;  %v1101_v61 = vpop.f32.mrb[7].mxu1  ;;  %v1255_v5 = vpop.f32.mrb[11].mxu0 }
 0x2f1   :  { %2309 = vtanh.f32 %v2283_v0  ;;  %v2281_v6 = vadd.f32 %v1101_v61, %v922_v51  ;;  %v2285_v25 = vadd.f32 %v1255_v5, %v930_v37 }
 0x2f2   :  { %2311 = vtanh.f32 %v2280_v63 }
 0x2f3   :  { %2313 = vtanh.f32 %v2284_v4 }
 0x2f4   :  { %2315 = vtanh.f32 %v2281_v6 }
 0x2f5   :  { %2317 = vtanh.f32 %v2285_v25 }
 0x2f8   :  { %v2304_v7 = vpop.eup %2303 }
 0x2f9   :  { %v2306_v8 = vpop.eup %2305  ;;  %1576 = vst [vmem:[%s4365_s7] sm:$0xff] %v2304_v7 }
 0x2fa   :  { %v2308_v9 = vpop.eup %2307  ;;  %1578 = vst [vmem:[%s4365_s7 + $0x10] sm:$0xff] %v2306_v8 }
 0x2fb   :  { %v2310_v10 = vpop.eup %2309  ;;  %1577 = vst [vmem:[%s4365_s7 + $0x8] sm:$0xff] %v2308_v9 }
 0x2fc   :  { %v2312_v11 = vpop.eup %2311  ;;  %1579 = vst [vmem:[%s4365_s7 + $0x18] sm:$0xff] %v2310_v10 }
 0x2fd   :  { %v2314_v12 = vpop.eup %2313  ;;  %1583 = vst [vmem:[%s4365_s7 + $0x38] sm:$0xff] %v2312_v11 }
 0x2fe   :  { %v2316_v13 = vpop.eup %2315  ;;  %1585 = vst [vmem:[%s4365_s7 + $0x48] sm:$0xff] %v2314_v12 }
 0x2ff   :  { %v2318_v14 = vpop.eup %2317  ;;  %1584 = vst [vmem:[%s4365_s7 + $0x40] sm:$0xff] %v2316_v13 }
 0x300   :  { %1586 = vst [vmem:[%s4365_s7 + $0x50] sm:$0xff] %v2318_v14 }
 0x30c   :  { %v1626_v16 = vpop.f32.mrb[12].mxu0 }
 0x30d   :  { %v1627_v17 = vpop.f32.mrb[13].mxu0 }
 0x30e   :  { %v1628_v41 = vadd.f32 %v1627_v17, %v1626_v16 }
 0x310   :  { %v1629_v18 = vpop.f32.mrb[14].mxu0  ;;  %v1479_v24 = vadd.f32 %v1628_v41, %v942_v21 }
 0x311   :  { %v1630_v19 = vpop.f32.mrb[15].mxu0 }
 0x312   :  { %v1631_v20 = vadd.f32 %v1630_v19, %v1629_v18 }
 0x314   :  { %v1484_v60 = vadd.f32 %v1631_v20, %v942_v21 }
 0x32d   :  { %v1664_v23 = vpop.f32.mrb[16].mxu0 }
 0x32e   :  { %v1665_v47 = vpop.f32.mrb[17].mxu0 }
 0x32f   :  { %v1666_v1 = vadd.f32 %v1665_v47, %v1664_v23 }
 0x331   :  { %v1554_v26 = vadd.f32 %v1666_v1, %v1479_v24  ;;  %v1667_v28 = vpop.f32.mrb[18].mxu0 }
 0x332   :  { %v1668_v29 = vpop.f32.mrb[19].mxu0 }
 0x333   :  { %2319 = vtanh.f32 %v1554_v26  ;;  %v1669_v30 = vadd.f32 %v1668_v29, %v1667_v28 }
 0x335   :  { %v1559_v31 = vadd.f32 %v1669_v30, %v1484_v60 }
 0x337   :  { %2321 = vtanh.f32 %v1559_v31 }
 0x33d   :  { %v2320_v15 = vpop.eup %2319 }
 0x33e   :  { %1582 = vst [vmem:[%s4365_s7 + $0x30] sm:$0xff] %v2320_v15 }
 0x341   :  { %v2322_v32 = vpop.eup %2321 }
 0x342   :  { %1589 = vst [vmem:[%s4365_s7 + $0x68] sm:$0xff] %v2322_v32 }
 0x36d   :  { %v1401_v36 = vpop.f32.mrb[8].mxu1 }
 0x36e   :  { %v2286_v40 = vadd.f32 %v1401_v36, %v934_v27  ;;  %v1403_v54 = vpop.f32.mrb[9].mxu1 }
 0x36f   :  { %v2287_v38 = vadd.f32 %v1403_v54, %v938_v35 }
 0x370   :  { %2323 = vtanh.f32 %v2286_v40 }
 0x371   :  { %2325 = vtanh.f32 %v2287_v38  ;;  %v1407_v39 = vpop.f32.mrb[10].mxu1 }
 0x372   :  { %v2288_v42 = vadd.f32 %v1407_v39, %v934_v27  ;;  %v1409_v43 = vpop.f32.mrb[11].mxu1 }
 0x373   :  { %v2289_v44 = vadd.f32 %v1409_v43, %v938_v35 }
 0x374   :  { %2327 = vtanh.f32 %v2288_v42 }
 0x375   :  { %2329 = vtanh.f32 %v2289_v44 }
 0x37a   :  { %v2324_v3 = vpop.eup %2323 }
 0x37b   :  { %v2326_v48 = vpop.eup %2325  ;;  %1580 = vst [vmem:[%s4365_s7 + $0x20] sm:$0xff] %v2324_v3 }
 0x37c   :  { %1581 = vst [vmem:[%s4365_s7 + $0x28] sm:$0xff] %v2326_v48 }
 0x37e   :  { %v2328_v58 = vpop.eup %2327 }
 0x37f   :  { %v2330_v46 = vpop.eup %2329  ;;  %1587 = vst [vmem:[%s4365_s7 + $0x58] sm:$0xff] %v2328_v58 }
 0x380   :  { %1588 = vst [vmem:[%s4365_s7 + $0x60] sm:$0xff] %v2330_v46 }

</bundles_post_ra>
